<compile_context>
chip_gen: v5e
topology: v5e:2x2
jax: 0.10.0
libtpu: 0.0.40
codegen_flags: <defaults>
</compile_context>

<pallas_src>
import functools

import numpy as np

import jax
import jax.numpy as jnp
from jax.experimental import pallas as pl
from jax.experimental.pallas import tpu as pltpu

# mtSpatialPoolingFilter from _DEFAULT_PARAMETERS (19 symmetric taps).
FILTER_TAPS = (
    0.0014794516787135662, 0.003804239018665086, 0.00875346226514214,
    0.018023411141080636, 0.03320772876259043, 0.05475028876252328,
    0.0807753247211904, 0.10663900118033988, 0.12597909446198644,
    0.1331759960155365, 0.12597909446198644, 0.10663900118033988,
    0.0807753247211904, 0.05475028876252328, 0.03320772876259043,
    0.018023411141080636, 0.00875346226514214, 0.003804239018665086,
    0.0014794516787135662,
)


def _toeplitz_valid(taps, n_in):
    """Banded (n_out, n_in) matrix T with T[o, o:o+K] = taps ('valid' conv)."""
    K = len(taps)
    n_out = n_in - K + 1
    t = np.zeros((n_out, n_in), np.float32)
    row = np.asarray(taps, np.float32)
    for o in range(n_out):
        t[o, o:o + K] = row
    return jnp.asarray(t)


def _conv_d_valid(x, taps, n_out):
    """'valid' conv along axis 0 (the page axis) — unrolled VPU madds.

    Axis-0 slices just select whole (H, lane) vreg planes, so this pass is
    relayout-free; symmetric taps are paired to halve the multiplies.
    """
    K = len(taps)

    def plane(k):
        return x[k:k + n_out].astype(jnp.float32)   # (n_out, H, TL)

    if K % 2 == 1 and all(taps[k] == taps[K - 1 - k] for k in range(K // 2)):
        half = K // 2
        acc = taps[half] * plane(half)
        for k in range(half):
            acc = acc + taps[k] * (plane(k) + plane(K - 1 - k))
        return acc

    acc = taps[0] * plane(0)
    for k in range(1, K):
        acc = acc + taps[k] * plane(k)
    return acc


def _blur_kernel(th_ref, x_ref, o_ref, *, taps, d_out):
    # th_ref: (Ho, H) f32 Toeplitz matrix (same block every grid step).
    # x_ref : (D, H, TL) lane-dense input block.
    # o_ref : (Do, Ho, TL) lane-dense output block.
    x = x_ref[...]
    y = _conv_d_valid(x, taps, d_out)            # (Do, H, TL) f32 — VPU pass
    th = th_ref[...]                              # (Ho, H) f32
    for e in range(d_out):                        # Do small MXU matmuls
        z = jnp.dot(th, y[e],
                    precision=jax.lax.Precision.HIGHEST,
                    preferred_element_type=jnp.float32)   # (Ho, TL)
        o_ref[e] = z.astype(o_ref.dtype)


def _pick_lane_tile(L, per_col_bytes, target_bytes=8 << 20):
    """Largest lane tile (multiple of 128 or full extent) within a VMEM budget.

    The budget counts double-buffered in/out tiles plus the f32 intermediate,
    and is kept well under v5e's 16 MiB scoped default.
    """
    if L <= 128:
        return L                                    # full (possibly <128) extent
    budget_cols = max(128, (target_bytes // max(per_col_bytes, 1)) // 128 * 128)
    if L % 128 == 0:
        best = 128
        for cand in range(128, min(L, budget_cols) + 1, 128):
            if L % cand == 0:
                best = cand
        return best
    if L * per_col_bytes <= target_bytes:
        return L                                    # full ragged extent still fits
    # 128-aligned tile + ragged tail (Pallas masks the out-of-bounds writeback).
    return max(128, min(budget_cols, (L // 128) * 128))


def blur_pallas(x: jax.Array, taps=FILTER_TAPS) -> jax.Array:
    """Depthwise separable 'valid' blur of dims -3 and -2 of a 5-D tensor."""
    assert x.ndim == 5, "expected (B, C, d2, d3, d4)"
    B, C, D, H, W = x.shape
    K = len(taps)
    assert D >= K and H >= K, "'valid' blur requires blurred dims >= filter length"
    Do, Ho = D - K + 1, H - K + 1

    N = B * C
    L = N * W

    # Fold N into the lane dim so blocks are lane-dense even for small W.
    xt = jnp.transpose(x.reshape(N, D, H, W), (1, 2, 0, 3)).reshape(D, H, L)
    th = _toeplitz_valid(taps, H)                   # (Ho, H) banded filter matrix

    itemsize = jnp.dtype(x.dtype).itemsize
    # VMEM per lane column: 2x input + 2x output (double-buffered) + f32 temps.
    per_col = itemsize * (2 * D * H + 2 * Do * Ho) + 4 * (Do * H + D * H)
    tl = _pick_lane_tile(L, per_col)
    grid = (pl.cdiv(L, tl),)

    # Advisory cost hint: streaming op; ~2K madds (VPU pass) + 2H flops per
    # output element (MXU pass).
    flops = 2 * K * Do * H * L + 2 * H * Ho * Do * L
    bytes_accessed = (D * H * L + Do * Ho * L) * itemsize + th.size * 4
    cost = pl.CostEstimate(flops=int(flops), transcendentals=0,
                           bytes_accessed=int(bytes_accessed))

    out = pl.pallas_call(
        functools.partial(_blur_kernel,
                          taps=tuple(float(t) for t in taps), d_out=Do),
        out_shape=jax.ShapeDtypeStruct((Do, Ho, L), x.dtype),
        grid_spec=pltpu.PrefetchScalarGridSpec(
            num_scalar_prefetch=0,
            grid=grid,
            in_specs=[pl.BlockSpec((Ho, H), lambda l: (0, 0)),
                      pl.BlockSpec((D, H, tl), lambda l: (0, 0, l))],
            out_specs=pl.BlockSpec((Do, Ho, tl), lambda l: (0, 0, l)),
        ),
        compiler_params=pltpu.CompilerParams(
            dimension_semantics=("parallel",)),
        cost_estimate=cost,
    )(th, xt)

    # Unfold back to (B, C, Do, Ho, W).
    return jnp.transpose(out.reshape(Do, Ho, N, W),
                         (2, 0, 1, 3)).reshape(B, C, Do, Ho, W)


def _blur_ref(x, taps=FILTER_TAPS):
    """Pure-JAX reference for the separable valid blur (matches conv3d order)."""
    K = len(taps)
    Ho = x.shape[3] - K + 1
    y = sum(taps[k] * x[:, :, :, k:k + Ho, :] for k in range(K))
    Do = x.shape[2] - K + 1
    return sum(taps[k] * y[:, :, k:k + Do, :, :] for k in range(K))


def _forward(inputs, padding, blur_fn):
    """Mirrors gaussian_blur(): multi-scale wrapper around the blur."""
    K = len(FILTER_TAPS)
    p = K // 2
    outs = []
    for i, x in enumerate(inputs):
        if i > 0:
            f = 2 ** i
            shp = x.shape[:2] + tuple(int(d * f) for d in x.shape[2:])
            # TODO(synk): F.interpolate(trilinear, align_corners=False) is reproduced
            # with jax.image.resize (plain JAX); not bit-exact vs torch.
            x = jax.image.resize(x, shp, method="trilinear", antialias=False)
        if padding == "same":
            # TODO(synk): fuse this 9-element reflect halo into the kernel (reversed
            # slices from the already-loaded block) to avoid the ~3x padded HBM copy.
            x = jnp.pad(x, ((0, 0), (0, 0), (p, p), (p, p), (0, 0)), mode="reflect")
        y = blur_fn(x)
        if i > 0:
            f = 0.5 ** i
            shp = y.shape[:2] + tuple(int(d * f) for d in y.shape[2:])
            y = jax.image.resize(y, shp, method="trilinear", antialias=False)
        outs.append(y)
    return outs


def mt_pre_threshold_blur(inputs, padding: str = "valid"):
    """Matches MTPreThresholdBlur.forward (Pallas blur)."""
    return _forward(inputs, padding, blur_pallas)


def mt_pre_threshold_blur_reference(inputs, padding: str = "valid"):
    """Pure-JAX reference for the whole forward."""
    return _forward(inputs, padding, _blur_ref)


if __name__ == "__main__":
    key = jax.random.PRNGKey(0)
    k1, k2 = jax.random.split(key)
    # Two pyramid scales of responses: (B, C, d2, d3, d4). The blur acts on
    # dims 2 and 3, which must be >= 19 after any upsampling ('valid' mode).
    x0 = jax.random.normal(k1, (2, 4, 24, 26, 16), dtype=jnp.float32)
    x1 = jax.random.normal(k2, (2, 4, 12, 14, 8), dtype=jnp.float32)
    inputs = [x0, x1]

    outs = mt_pre_threshold_blur(inputs, padding="valid")
    outs = [jax.block_until_ready(o) for o in outs]
    refs = mt_pre_threshold_blur_reference(inputs, padding="valid")
    for o, r in zip(outs, refs):
        assert o.shape == r.shape, (o.shape, r.shape)
        assert jnp.allclose(o, r, rtol=1e-4, atol=1e-4), "mismatch vs reference"

    # Also exercise 'same' (reflect) padding on the scale-0 tensor.
    o_same = jax.block_until_ready(mt_pre_threshold_blur([x0], padding="same")[0])
    r_same = mt_pre_threshold_blur_reference([x0], padding="same")[0]
    assert o_same.shape == x0.shape
    assert jnp.allclose(o_same, r_same, rtol=1e-4, atol=1e-4), "mismatch ('same')"

    print("KERNEL_OK")
</pallas_src>

<mosaic_0001>
module attributes {stable_mosaic.version = 11 : i64} {
  func.func @_blur_kernel(%arg0: i32, %arg1: memref<8x26xf32, #tpu.memory_space<vmem>>, %arg2: memref<24x26x128xf32, #tpu.memory_space<vmem>>, %arg3: memref<6x8x128xf32, #tpu.memory_space<vmem>>) attributes {dimension_semantics = [#tpu.dimension_semantics<parallel>], iteration_bounds = array<i64: 1>, scalar_prefetch = 0 : i64, scratch_operands = 0 : i64, tpu.core_type = #tpu.core_type<tc>, window_params = [{pipeline_mode = #tpu.pipeline_mode<synchronous>, transform_indices = @transform_0, window_bounds = array<i64: 8, 26>}, {transform_indices = @transform_1, window_bounds = array<i64: 24, 26, 128>}, {transform_indices = @transform_2, window_bounds = array<i64: 6, 8, 128>}]} {
    %c0 = arith.constant 0 : index
    %c0_0 = arith.constant 0 : index
    %c0_1 = arith.constant 0 : index
    %0 = vector.load %arg2[%c0, %c0_0, %c0_1] : memref<24x26x128xf32, #tpu.memory_space<vmem>>, vector<24x26x128xf32>
    %1 = vector.extract_strided_slice %0 {offsets = [9, 0, 0], sizes = [6, 26, 128], strides = [1, 1, 1]} : vector<24x26x128xf32> to vector<6x26x128xf32>
    %cst = arith.constant 1.331760e-01 : f32
    %2 = vector.broadcast %cst : f32 to vector<6x26x128xf32>
    %3 = arith.mulf %2, %1 : vector<6x26x128xf32>
    %4 = vector.extract_strided_slice %0 {offsets = [0, 0, 0], sizes = [6, 26, 128], strides = [1, 1, 1]} : vector<24x26x128xf32> to vector<6x26x128xf32>
    %5 = vector.extract_strided_slice %0 {offsets = [18, 0, 0], sizes = [6, 26, 128], strides = [1, 1, 1]} : vector<24x26x128xf32> to vector<6x26x128xf32>
    %6 = arith.addf %4, %5 : vector<6x26x128xf32>
    %cst_2 = arith.constant 0.00147945166 : f32
    %7 = vector.broadcast %cst_2 : f32 to vector<6x26x128xf32>
    %8 = arith.mulf %7, %6 : vector<6x26x128xf32>
    %9 = arith.addf %3, %8 : vector<6x26x128xf32>
    %10 = vector.extract_strided_slice %0 {offsets = [1, 0, 0], sizes = [6, 26, 128], strides = [1, 1, 1]} : vector<24x26x128xf32> to vector<6x26x128xf32>
    %11 = vector.extract_strided_slice %0 {offsets = [17, 0, 0], sizes = [6, 26, 128], strides = [1, 1, 1]} : vector<24x26x128xf32> to vector<6x26x128xf32>
    %12 = arith.addf %10, %11 : vector<6x26x128xf32>
    %cst_3 = arith.constant 0.00380423898 : f32
    %13 = vector.broadcast %cst_3 : f32 to vector<6x26x128xf32>
    %14 = arith.mulf %13, %12 : vector<6x26x128xf32>
    %15 = arith.addf %9, %14 : vector<6x26x128xf32>
    %16 = vector.extract_strided_slice %0 {offsets = [2, 0, 0], sizes = [6, 26, 128], strides = [1, 1, 1]} : vector<24x26x128xf32> to vector<6x26x128xf32>
    %17 = vector.extract_strided_slice %0 {offsets = [16, 0, 0], sizes = [6, 26, 128], strides = [1, 1, 1]} : vector<24x26x128xf32> to vector<6x26x128xf32>
    %18 = arith.addf %16, %17 : vector<6x26x128xf32>
    %cst_4 = arith.constant 0.00875346269 : f32
    %19 = vector.broadcast %cst_4 : f32 to vector<6x26x128xf32>
    %20 = arith.mulf %19, %18 : vector<6x26x128xf32>
    %21 = arith.addf %15, %20 : vector<6x26x128xf32>
    %22 = vector.extract_strided_slice %0 {offsets = [3, 0, 0], sizes = [6, 26, 128], strides = [1, 1, 1]} : vector<24x26x128xf32> to vector<6x26x128xf32>
    %23 = vector.extract_strided_slice %0 {offsets = [15, 0, 0], sizes = [6, 26, 128], strides = [1, 1, 1]} : vector<24x26x128xf32> to vector<6x26x128xf32>
    %24 = arith.addf %22, %23 : vector<6x26x128xf32>
    %cst_5 = arith.constant 0.0180234108 : f32
    %25 = vector.broadcast %cst_5 : f32 to vector<6x26x128xf32>
    %26 = arith.mulf %25, %24 : vector<6x26x128xf32>
    %27 = arith.addf %21, %26 : vector<6x26x128xf32>
    %28 = vector.extract_strided_slice %0 {offsets = [4, 0, 0], sizes = [6, 26, 128], strides = [1, 1, 1]} : vector<24x26x128xf32> to vector<6x26x128xf32>
    %29 = vector.extract_strided_slice %0 {offsets = [14, 0, 0], sizes = [6, 26, 128], strides = [1, 1, 1]} : vector<24x26x128xf32> to vector<6x26x128xf32>
    %30 = arith.addf %28, %29 : vector<6x26x128xf32>
    %cst_6 = arith.constant 0.0332077295 : f32
    %31 = vector.broadcast %cst_6 : f32 to vector<6x26x128xf32>
    %32 = arith.mulf %31, %30 : vector<6x26x128xf32>
    %33 = arith.addf %27, %32 : vector<6x26x128xf32>
    %34 = vector.extract_strided_slice %0 {offsets = [5, 0, 0], sizes = [6, 26, 128], strides = [1, 1, 1]} : vector<24x26x128xf32> to vector<6x26x128xf32>
    %35 = vector.extract_strided_slice %0 {offsets = [13, 0, 0], sizes = [6, 26, 128], strides = [1, 1, 1]} : vector<24x26x128xf32> to vector<6x26x128xf32>
    %36 = arith.addf %34, %35 : vector<6x26x128xf32>
    %cst_7 = arith.constant 0.0547502898 : f32
    %37 = vector.broadcast %cst_7 : f32 to vector<6x26x128xf32>
    %38 = arith.mulf %37, %36 : vector<6x26x128xf32>
    %39 = arith.addf %33, %38 : vector<6x26x128xf32>
    %40 = vector.extract_strided_slice %0 {offsets = [6, 0, 0], sizes = [6, 26, 128], strides = [1, 1, 1]} : vector<24x26x128xf32> to vector<6x26x128xf32>
    %41 = vector.extract_strided_slice %0 {offsets = [12, 0, 0], sizes = [6, 26, 128], strides = [1, 1, 1]} : vector<24x26x128xf32> to vector<6x26x128xf32>
    %42 = arith.addf %40, %41 : vector<6x26x128xf32>
    %cst_8 = arith.constant 0.0807753279 : f32
    %43 = vector.broadcast %cst_8 : f32 to vector<6x26x128xf32>
    %44 = arith.mulf %43, %42 : vector<6x26x128xf32>
    %45 = arith.addf %39, %44 : vector<6x26x128xf32>
    %46 = vector.extract_strided_slice %0 {offsets = [7, 0, 0], sizes = [6, 26, 128], strides = [1, 1, 1]} : vector<24x26x128xf32> to vector<6x26x128xf32>
    %47 = vector.extract_strided_slice %0 {offsets = [11, 0, 0], sizes = [6, 26, 128], strides = [1, 1, 1]} : vector<24x26x128xf32> to vector<6x26x128xf32>
    %48 = arith.addf %46, %47 : vector<6x26x128xf32>
    %cst_9 = arith.constant 1.066390e-01 : f32
    %49 = vector.broadcast %cst_9 : f32 to vector<6x26x128xf32>
    %50 = arith.mulf %49, %48 : vector<6x26x128xf32>
    %51 = arith.addf %45, %50 : vector<6x26x128xf32>
    %52 = vector.extract_strided_slice %0 {offsets = [8, 0, 0], sizes = [6, 26, 128], strides = [1, 1, 1]} : vector<24x26x128xf32> to vector<6x26x128xf32>
    %53 = vector.extract_strided_slice %0 {offsets = [10, 0, 0], sizes = [6, 26, 128], strides = [1, 1, 1]} : vector<24x26x128xf32> to vector<6x26x128xf32>
    %54 = arith.addf %52, %53 : vector<6x26x128xf32>
    %cst_10 = arith.constant 0.125979096 : f32
    %55 = vector.broadcast %cst_10 : f32 to vector<6x26x128xf32>
    %56 = arith.mulf %55, %54 : vector<6x26x128xf32>
    %57 = arith.addf %51, %56 : vector<6x26x128xf32>
    %c0_11 = arith.constant 0 : index
    %c0_12 = arith.constant 0 : index
    %58 = vector.load %arg1[%c0_11, %c0_12] : memref<8x26xf32, #tpu.memory_space<vmem>>, vector<8x26xf32>
    %59 = vector.extract_strided_slice %57 {offsets = [0, 0, 0], sizes = [1, 26, 128], strides = [1, 1, 1]} : vector<6x26x128xf32> to vector<1x26x128xf32>
    %60 = vector.shape_cast %59 : vector<1x26x128xf32> to vector<26x128xf32>
    %cst_13 = arith.constant dense<0.000000e+00> : vector<8x128xf32>
    %61 = tpu.matmul %58, %60, %cst_13 {dimension_numbers = #tpu.dot_dimension_numbers<[1], [0], [0], [1], [0, 0, 1, 1], [], []>, precision = #tpu.contract_precision<fp32>} : vector<8x26xf32>, vector<26x128xf32>, vector<8x128xf32> -> vector<8x128xf32>
    %c0_14 = arith.constant 0 : index
    %c0_15 = arith.constant 0 : index
    %c0_16 = arith.constant 0 : index
    %62 = vector.load %arg3[%c0_14, %c0_15, %c0_16] : memref<6x8x128xf32, #tpu.memory_space<vmem>>, vector<1x8x128xf32>
    %63 = vector.shape_cast %62 : vector<1x8x128xf32> to vector<8x128xf32>
    %64 = vector.shape_cast %61 : vector<8x128xf32> to vector<1x8x128xf32>
    tpu.vector_store %arg3[%c0_14, %c0_15, %c0_16], %64 {strides = array<i32>} : memref<6x8x128xf32, #tpu.memory_space<vmem>>, vector<1x8x128xf32>,
    %65 = vector.extract_strided_slice %57 {offsets = [1, 0, 0], sizes = [1, 26, 128], strides = [1, 1, 1]} : vector<6x26x128xf32> to vector<1x26x128xf32>
    %66 = vector.shape_cast %65 : vector<1x26x128xf32> to vector<26x128xf32>
    %cst_17 = arith.constant dense<0.000000e+00> : vector<8x128xf32>
    %67 = tpu.matmul %58, %66, %cst_17 {dimension_numbers = #tpu.dot_dimension_numbers<[1], [0], [0], [1], [0, 0, 1, 1], [], []>, precision = #tpu.contract_precision<fp32>} : vector<8x26xf32>, vector<26x128xf32>, vector<8x128xf32> -> vector<8x128xf32>
    %c1 = arith.constant 1 : index
    %c0_18 = arith.constant 0 : index
    %c0_19 = arith.constant 0 : index
    %68 = vector.load %arg3[%c1, %c0_18, %c0_19] : memref<6x8x128xf32, #tpu.memory_space<vmem>>, vector<1x8x128xf32>
    %69 = vector.shape_cast %68 : vector<1x8x128xf32> to vector<8x128xf32>
    %70 = vector.shape_cast %67 : vector<8x128xf32> to vector<1x8x128xf32>
    tpu.vector_store %arg3[%c1, %c0_18, %c0_19], %70 {strides = array<i32>} : memref<6x8x128xf32, #tpu.memory_space<vmem>>, vector<1x8x128xf32>,
    %71 = vector.extract_strided_slice %57 {offsets = [2, 0, 0], sizes = [1, 26, 128], strides = [1, 1, 1]} : vector<6x26x128xf32> to vector<1x26x128xf32>
    %72 = vector.shape_cast %71 : vector<1x26x128xf32> to vector<26x128xf32>
    %cst_20 = arith.constant dense<0.000000e+00> : vector<8x128xf32>
    %73 = tpu.matmul %58, %72, %cst_20 {dimension_numbers = #tpu.dot_dimension_numbers<[1], [0], [0], [1], [0, 0, 1, 1], [], []>, precision = #tpu.contract_precision<fp32>} : vector<8x26xf32>, vector<26x128xf32>, vector<8x128xf32> -> vector<8x128xf32>
    %c2 = arith.constant 2 : index
    %c0_21 = arith.constant 0 : index
    %c0_22 = arith.constant 0 : index
    %74 = vector.load %arg3[%c2, %c0_21, %c0_22] : memref<6x8x128xf32, #tpu.memory_space<vmem>>, vector<1x8x128xf32>
    %75 = vector.shape_cast %74 : vector<1x8x128xf32> to vector<8x128xf32>
    %76 = vector.shape_cast %73 : vector<8x128xf32> to vector<1x8x128xf32>
    tpu.vector_store %arg3[%c2, %c0_21, %c0_22], %76 {strides = array<i32>} : memref<6x8x128xf32, #tpu.memory_space<vmem>>, vector<1x8x128xf32>,
    %77 = vector.extract_strided_slice %57 {offsets = [3, 0, 0], sizes = [1, 26, 128], strides = [1, 1, 1]} : vector<6x26x128xf32> to vector<1x26x128xf32>
    %78 = vector.shape_cast %77 : vector<1x26x128xf32> to vector<26x128xf32>
    %cst_23 = arith.constant dense<0.000000e+00> : vector<8x128xf32>
    %79 = tpu.matmul %58, %78, %cst_23 {dimension_numbers = #tpu.dot_dimension_numbers<[1], [0], [0], [1], [0, 0, 1, 1], [], []>, precision = #tpu.contract_precision<fp32>} : vector<8x26xf32>, vector<26x128xf32>, vector<8x128xf32> -> vector<8x128xf32>
    %c3 = arith.constant 3 : index
    %c0_24 = arith.constant 0 : index
    %c0_25 = arith.constant 0 : index
    %80 = vector.load %arg3[%c3, %c0_24, %c0_25] : memref<6x8x128xf32, #tpu.memory_space<vmem>>, vector<1x8x128xf32>
    %81 = vector.shape_cast %80 : vector<1x8x128xf32> to vector<8x128xf32>
    %82 = vector.shape_cast %79 : vector<8x128xf32> to vector<1x8x128xf32>
    tpu.vector_store %arg3[%c3, %c0_24, %c0_25], %82 {strides = array<i32>} : memref<6x8x128xf32, #tpu.memory_space<vmem>>, vector<1x8x128xf32>,
    %83 = vector.extract_strided_slice %57 {offsets = [4, 0, 0], sizes = [1, 26, 128], strides = [1, 1, 1]} : vector<6x26x128xf32> to vector<1x26x128xf32>
    %84 = vector.shape_cast %83 : vector<1x26x128xf32> to vector<26x128xf32>
    %cst_26 = arith.constant dense<0.000000e+00> : vector<8x128xf32>
    %85 = tpu.matmul %58, %84, %cst_26 {dimension_numbers = #tpu.dot_dimension_numbers<[1], [0], [0], [1], [0, 0, 1, 1], [], []>, precision = #tpu.contract_precision<fp32>} : vector<8x26xf32>, vector<26x128xf32>, vector<8x128xf32> -> vector<8x128xf32>
    %c4 = arith.constant 4 : index
    %c0_27 = arith.constant 0 : index
    %c0_28 = arith.constant 0 : index
    %86 = vector.load %arg3[%c4, %c0_27, %c0_28] : memref<6x8x128xf32, #tpu.memory_space<vmem>>, vector<1x8x128xf32>
    %87 = vector.shape_cast %86 : vector<1x8x128xf32> to vector<8x128xf32>
    %88 = vector.shape_cast %85 : vector<8x128xf32> to vector<1x8x128xf32>
    tpu.vector_store %arg3[%c4, %c0_27, %c0_28], %88 {strides = array<i32>} : memref<6x8x128xf32, #tpu.memory_space<vmem>>, vector<1x8x128xf32>,
    %89 = vector.extract_strided_slice %57 {offsets = [5, 0, 0], sizes = [1, 26, 128], strides = [1, 1, 1]} : vector<6x26x128xf32> to vector<1x26x128xf32>
    %90 = vector.shape_cast %89 : vector<1x26x128xf32> to vector<26x128xf32>
    %cst_29 = arith.constant dense<0.000000e+00> : vector<8x128xf32>
    %91 = tpu.matmul %58, %90, %cst_29 {dimension_numbers = #tpu.dot_dimension_numbers<[1], [0], [0], [1], [0, 0, 1, 1], [], []>, precision = #tpu.contract_precision<fp32>} : vector<8x26xf32>, vector<26x128xf32>, vector<8x128xf32> -> vector<8x128xf32>
    %c5 = arith.constant 5 : index
    %c0_30 = arith.constant 0 : index
    %c0_31 = arith.constant 0 : index
    %92 = vector.load %arg3[%c5, %c0_30, %c0_31] : memref<6x8x128xf32, #tpu.memory_space<vmem>>, vector<1x8x128xf32>
    %93 = vector.shape_cast %92 : vector<1x8x128xf32> to vector<8x128xf32>
    %94 = vector.shape_cast %91 : vector<8x128xf32> to vector<1x8x128xf32>
    tpu.vector_store %arg3[%c5, %c0_30, %c0_31], %94 {strides = array<i32>} : memref<6x8x128xf32, #tpu.memory_space<vmem>>, vector<1x8x128xf32>,
    return
  }
  func.func @transform_0(%arg0: i32) -> (i32, i32) {
    %c0_i32 = arith.constant 0 : i32
    %c0_i32_0 = arith.constant 0 : i32
    %c0_i32_1 = arith.constant 0 : i32
    return %c0_i32, %c0_i32_0 : i32, i32
  }
  func.func @transform_1(%arg0: i32) -> (i32, i32, i32) {
    %c0_i32 = arith.constant 0 : i32
    %c0_i32_0 = arith.constant 0 : i32
    %c0_i32_1 = arith.constant 0 : i32
    return %c0_i32, %c0_i32_0, %arg0 : i32, i32, i32
  }
  func.func @transform_2(%arg0: i32) -> (i32, i32, i32) {
    %c0_i32 = arith.constant 0 : i32
    %c0_i32_0 = arith.constant 0 : i32
    %c0_i32_1 = arith.constant 0 : i32
    return %c0_i32, %c0_i32_0, %arg0 : i32, i32, i32
  }
}

</mosaic_0001>

<bundles_post_ra>
// kernel: tpu_custom_call.1
= control target key start
LH: loop header
LB: loop body
LE: loop exit
PB: predicated region body
PF: predicated region fallthrough
CT: control target
= control target key end

     0   :  { %vm785_vm0 = vcmask 1041408   ;;  %vm781_vm1 = vcmask 211968   ;;  %s3729_s0 = inlined_call_operand.vmem [shape: f32[8,26], index: 0, kind: input, shape index: {}]   ;;  %s3730_s1 = inlined_call_operand.vmem [shape: f32[24,26,128], index: 1, kind: input, shape index: {}]   ;;  %s3731_s2 = inlined_call_operand.hbm [shape: f32[6,8,128], index: 2, kind: output, shape index: {}]  }
   0x1   :  { %v2064_v0 = vld [vmem:[%s3730_s1 + $0x38] sm:$0x3]  ;;  %v2185_v39 = vld [vmem:[%s3730_s1 + $0x50] sm:$0xff] }
   0x2   :  { %v2069_v1 = vld [vmem:[%s3730_s1 + $0x58] sm:$0x3]  ;;  %3932 = vst [vmem:[#allocation22_spill] sm:$0xff] %v2185_v39  ;;  %v2190_v40 = vld [vmem:[%s3730_s1 + $0x70] sm:$0xff] }
   0x3   :  { %3915 = vst [vmem:[#allocation5_spill] sm:$0xff] %v2069_v1  ;;  %v2074_v2 = vld [vmem:[%s3730_s1 + $0x78] sm:$0x3]  ;;  %v2195_v41 = vld [vmem:[%s3730_s1 + $0x90] sm:$0xff] }
   0x4   :  { %3916 = vst [vmem:[#allocation6_spill] sm:$0xff] %v2074_v2  ;;  %v2079_v3 = vld [vmem:[%s3730_s1 + $0x98] sm:$0x3]  ;;  %v14_v43 = vld [vmem:[%s3730_s1 + $0x10] sm:$0xff] }
   0x5   :  { %3917 = vst [vmem:[#allocation7_spill] sm:$0xff] %v2079_v3  ;;  %v2084_v4 = vld [vmem:[%s3730_s1 + $0xb8] sm:$0x3]  ;;  %v2203_v44 = vld [vmem:[%s3730_s1 + $0x30] sm:$0xff] }
   0x6   :  { %3918 = vst [vmem:[#allocation8_spill] sm:$0xff] %v2084_v4  ;;  %v15_v5 = vld [vmem:[%s3730_s1 + $0x18] sm:$0x3]  ;;  %v2208_v45 = vld [vmem:[%s3730_s1 + $0xb0] sm:$0xff] }
   0x7   :  { %v2092_v6 = vld [vmem:[%s3730_s1 + $0xd8] sm:$0x3]  ;;  %3933 = vst [vmem:[#allocation23_spill] sm:$0xff] %v2190_v40  ;;  %v2213_v46 = vld [vmem:[%s3730_s1 + $0xd0] sm:$0xff] }
   0x8   :  { %3919 = vst [vmem:[#allocation9_spill] sm:$0xff] %v2092_v6  ;;  %v2097_v7 = vld [vmem:[%s3730_s1 + $0xf8] sm:$0x3]  ;;  %v2218_v47 = vld [vmem:[%s3730_s1 + $0xf0] sm:$0xff] }
   0x9   :  { %3920 = vst [vmem:[#allocation10_spill] sm:$0xff] %v2097_v7  ;;  %v2102_v8 = vld [vmem:[%s3730_s1 + $0x118] sm:$0x3]  ;;  %v2228_v50 = vld [vmem:[%s3730_s1 + $0x110] sm:$0xff] }
   0xa   :  { %3921 = vst [vmem:[#allocation11_spill] sm:$0xff] %v2102_v8  ;;  %v2107_v9 = vld [vmem:[%s3730_s1 + $0x138] sm:$0x3]  ;;  %v2233_v51 = vld [vmem:[%s3730_s1 + $0x130] sm:$0xff] }
   0xb   :  { %3922 = vst [vmem:[#allocation12_spill] sm:$0xff] %v2107_v9  ;;  %v2112_v10 = vld [vmem:[%s3730_s1 + $0x158] sm:$0x3]  ;;  %v111_v27 = vmul.f32 0.133176, %v2107_v9  ;;  %v2238_v52 = vld [vmem:[%s3730_s1 + $0x150] sm:$0xff] }
   0xc   :  { %3923 = vst [vmem:[#allocation13_spill] sm:$0xff] %v2112_v10  ;;  %v2117_v11 = vld [vmem:[%s3730_s1 + $0x178] sm:$0x3]  ;;  %v711_v26 = vadd.f32 %v2112_v10, %v2102_v8  ;;  %v2221_v48 = vmul.f32 0.133176, %v2112_v10  ;;  %v2245_v55 = vld [vmem:[%s3730_s1 + $0x170] sm:$0xff]  ;;  %v710_v59 = vadd.f32 %v2238_v52, %v2228_v50 }
   0xd   :  { %3924 = vst [vmem:[#allocation14_spill] sm:$0xff] %v2117_v11  ;;  %v2122_v12 = vld [vmem:[%s3730_s1 + $0x198] sm:$0x3]  ;;  %v639_v21 = vadd.f32 %v2117_v11, %v2097_v7  ;;  %v2250_v56 = vld [vmem:[%s3730_s1 + $0x190] sm:$0xff]  ;;  %v110_v58 = vmul.f32 0.133176, %v2233_v51 }
   0xe   :  { %3925 = vst [vmem:[#allocation15_spill] sm:$0xff] %v2122_v12  ;;  %v2127_v13 = vld [vmem:[%s3730_s1 + $0x1b8] sm:$0x3]  ;;  %v567_v20 = vadd.f32 %v2122_v12, %v2092_v6  ;;  %v2180_v38 = vmul.f32 0.1259791, %v711_v26  ;;  %v2255_v57 = vld [vmem:[%s3730_s1 + $0x1b0] sm:$0xff] }
   0xf   :  { %3926 = vst [vmem:[#allocation16_spill] sm:$0xff] %v2127_v13  ;;  %v2132_v14 = vld [vmem:[%s3730_s1 + $0x1d8] sm:$0x3]  ;;  %v495_v19 = vadd.f32 %v2127_v13, %v2084_v4  ;;  %v2176_v36 = vmul.f32 0.106639, %v639_v21  ;;  %v2265_v61 = vld [vmem:[%s3730_s1 + $0x1d0] sm:$0xff] }
  0x10   :  { %3927 = vst [vmem:[#allocation17_spill] sm:$0xff] %v2132_v14  ;;  %v2137_v15 = vld [vmem:[%s3730_s1 + $0x1f8] sm:$0x3]  ;;  %v423_v18 = vadd.f32 %v2132_v14, %v2079_v3  ;;  %v2174_v33 = vmul.f32 0.08077533, %v567_v20  ;;  %v2270_v62 = vld [vmem:[%s3730_s1 + $0x1f0] sm:$0xff] }
  0x11   :  { %3928 = vst [vmem:[#allocation18_spill] sm:$0xff] %v2137_v15  ;;  %v2142_v16 = vld [vmem:[%s3730_s1 + $0x218] sm:$0x3]  ;;  %v351_v25 = vadd.f32 %v2137_v15, %v2074_v2  ;;  %v2172_v30 = vmul.f32 0.05475029, %v495_v19  ;;  %v2275_v63 = vld [vmem:[%s3730_s1 + $0x210] sm:$0xff]  ;;  %v638_v19 = vadd.f32 %v2245_v55, %v2218_v47  ;;  %v350_v26 = vadd.f32 %v2270_v62, %v2190_v40 }
  0x12   :  { %3929 = vst [vmem:[#allocation19_spill] sm:$0xff] %v2142_v16  ;;  %v2147_v17 = vld [vmem:[%s3730_s1 + $0x238] sm:$0x3]  ;;  %v279_v24 = vadd.f32 %v2142_v16, %v2069_v1  ;;  %v447_v29 = vmul.f32 0.03320773, %v423_v18  ;;  %v355_v60 = vadd.f32 %v2142_v16, %v2079_v3  ;;  %v566_v18 = vadd.f32 %v2250_v56, %v2213_v46 }
  0x13   :  { %3930 = vst [vmem:[#allocation20_spill] sm:$0xff] %v2147_v17  ;;  %v2160_v22 = vld [vmem:[%s3730_s1 + $0x258] sm:$0x3]  ;;  %v207_v23 = vadd.f32 %v2147_v17, %v2064_v0  ;;  %v375_v35 = vmul.f32 0.01802341, %v351_v25  ;;  %v283_v49 = vadd.f32 %v2147_v17, %v2074_v2  ;;  %v278_v25 = vadd.f32 %v2275_v63, %v2185_v39  ;;  %v2424_v2 = vld [vmem:[%s3730_s1 + $0x228] sm:$0xff] }
  0x14   :  { %3931 = vst [vmem:[#allocation21_spill] sm:$0xff] %v2160_v22  ;;  %v135_v28 = vadd.f32 %v2160_v22, %v15_v5  ;;  %v303_v32 = vmul.f32 0.008753463, %v279_v24  ;;  %v211_v37 = vadd.f32 %v2160_v22, %v2069_v1  ;;  %v494_v5 = vadd.f32 %v2255_v57, %v2208_v45  ;;  %v2293_v24 = vld [vmem:[%s3730_s1 + $0x250] sm:$0xff]  ;;  %v2435_v1 = vld [vmem:[%s3730_s1 + $0x248] sm:$0xff] }
  0x15   :  { %v231_v31 = vmul.f32 0.003804239, %v207_v23  ;;  %3934 = vst [vmem:[#allocation24_spill] sm:$0xff] %v2195_v41  ;;  %v2283_v20 = vmul.f32 0.008753463, %v283_v49  ;;  %v2288_v23 = vld [vmem:[%s3730_s1 + $0x230] sm:$0xff]  ;;  %v427_v22 = vadd.f32 %v2137_v15, %v2084_v4 }
  0x16   :  { %v159_v34 = vmul.f32 0.0014794517, %v135_v28  ;;  %3935 = vst [vmem:[#allocation25_spill] sm:$0xff] %v2208_v45  ;;  %v2240_v53 = vmul.f32 0.003804239, %v211_v37  ;;  %v134_v28 = vadd.f32 %v2293_v24, %v14_v43  ;;  %v2395_v4 = vld [vmem:[%s3730_s1 + $0x1a8] sm:$0xff] }
  0x17   :  { %3936 = vst [vmem:[#allocation26_spill] sm:$0xff] %v2213_v46  ;;  %v374_v49 = vmul.f32 0.01802341, %v350_v26  ;;  %v2308_v17 = vmul.f32 0.106639, %v638_v19  ;;  %v2350_v26 = vld [vmem:[%s3730_s1 + $0xe8] sm:$0xff] }
  0x18   :  { %v183_v42 = vadd.f32 %v159_v34, %v111_v27  ;;  %3937 = vst [vmem:[#allocation27_spill] sm:$0xff] %v2265_v61  ;;  %v422_v27 = vadd.f32 %v2265_v61, %v2195_v41  ;;  %v2306_v34 = vmul.f32 0.08077533, %v566_v18  ;;  %v158_v10 = vmul.f32 0.0014794517, %v134_v28  ;;  %v2327_v18 = vld [vmem:[%s3730_s1 + $0x68] sm:$0xff] }
  0x19   :  { %3938 = vst [vmem:[#allocation28_spill] sm:$0xff] %v2270_v62  ;;  %v2312_v43 = vmul.f32 0.1259791, %v710_v59  ;;  %v2337_v59 = vld [vmem:[%s3730_s1 + $0xa8] sm:$0xff]  ;;  %v2377_v15 = vmul.f32 0.03320773, %v427_v22 }
  0x1a   :  { %v255_v54 = vadd.f32 %v231_v31, %v183_v42  ;;  %3939 = vst [vmem:[#allocation29_spill] sm:$0xff] %v2275_v63  ;;  %v206_v31 = vadd.f32 %v2288_v23, %v2203_v44  ;;  %v302_v42 = vmul.f32 0.008753463, %v278_v25  ;;  %v182_v19 = vadd.f32 %v158_v10, %v110_v58  ;;  %v2345_v25 = vld [vmem:[%s3730_s1 + $0xc8] sm:$0xff] }
  0x1b   :  { %3940 = vst [vmem:[#allocation30_spill] sm:$0xff] %v2288_v23  ;;  %v2357_v10 = vmul.f32 0.01802341, %v355_v60  ;;  %v499_v58 = vadd.f32 %v2132_v14, %v2092_v6  ;;  %v2375_v60 = vld [vmem:[%s3730_s1 + $0x168] sm:$0xff] }
  0x1c   :  { %v327_v21 = vadd.f32 %v303_v32, %v255_v54  ;;  %3941 = vst [vmem:[#allocation31_spill] sm:$0xff] %v2293_v24  ;;  %v2304_v32 = vmul.f32 0.05475029, %v494_v5  ;;  %v446_v54 = vmul.f32 0.03320773, %v422_v27  ;;  %v2317_v5 = vld [vmem:[%s3730_s1 + $0x28] sm:$0xff] }
  0x1d   :  { %v230_v16 = vmul.f32 0.003804239, %v206_v31  ;;  %3942 = vst [vmem:[#allocation32_spill] sm:$0xff] %v2317_v5  ;;  %v2355_v27 = vld [vmem:[%s3730_s1 + $0x108] sm:$0xff] }
  0x1e   :  { %v399_v37 = vadd.f32 %v375_v35, %v327_v21  ;;  %v2322_v35 = vld [vmem:[%s3730_s1 + $0x48] sm:$0xff]  ;;  %3944 = vst [vmem:[#allocation34_spill] sm:$0xff] %v2327_v18 }
  0x1f   :  { %3943 = vst [vmem:[#allocation33_spill] sm:$0xff] %v2322_v35  ;;  %v13_v21 = vld [vmem:[%s3730_s1 + $0x8] sm:$0xff]  ;;  %v254_v14 = vadd.f32 %v230_v16, %v182_v19  ;;  %v2408_v19 = vadd.f32 %v2122_v12, %v2102_v8 }
  0x20   :  { %v471_v3 = vadd.f32 %v447_v29, %v399_v37  ;;  %v2332_v29 = vld [vmem:[%s3730_s1 + $0x88] sm:$0xff]  ;;  %3946 = vst [vmem:[#allocation36_spill] sm:$0xff] %v2337_v59 }
  0x21   :  { %3945 = vst [vmem:[#allocation35_spill] sm:$0xff] %v2332_v29  ;;  %v2365_v31 = vld [vmem:[%s3730_s1 + $0x128] sm:$0xff]  ;;  %v326_v8 = vadd.f32 %v302_v42, %v254_v14  ;;  %v133_v14 = vadd.f32 %v2435_v1, %v13_v21  ;;  %v2493_v21 = vld [vmem:[%s3730_s1 + $0x120] sm:$0xff] }
  0x22   :  { %3947 = vst [vmem:[#allocation37_spill] sm:$0xff] %v2345_v25  ;;  %v543_v28 = vadd.f32 %v2172_v30, %v471_v3  ;;  %v2370_v37 = vld [vmem:[%s3730_s1 + $0x148] sm:$0xff]  ;;  %v2381_v3 = vadd.f32 %v2127_v13, %v2097_v7  ;;  %v2385_v30 = vadd.f32 %v2293_v24, %v2185_v39  ;;  %v637_v24 = vadd.f32 %v2375_v60, %v2350_v26 }
  0x23   :  { %3948 = vst [vmem:[#allocation38_spill] sm:$0xff] %v2350_v26  ;;  %v2390_v6 = vld [vmem:[%s3730_s1 + $0x188] sm:$0xff]  ;;  %v709_v16 = vadd.f32 %v2370_v37, %v2355_v27 }
  0x24   :  { %3949 = vst [vmem:[#allocation39_spill] sm:$0xff] %v2355_v27  ;;  %v2400_v22 = vld [vmem:[%s3730_s1 + $0x1c8] sm:$0xff]  ;;  %v615_v39 = vadd.f32 %v2174_v33, %v543_v28  ;;  %v493_v33 = vadd.f32 %v2395_v4, %v2337_v59  ;;  %v565_v28 = vadd.f32 %v2390_v6, %v2345_v25 }
  0x25   :  { %3950 = vst [vmem:[#allocation40_spill] sm:$0xff] %v2370_v37  ;;  %v2414_v13 = vld [vmem:[%s3730_s1 + $0x1e8] sm:$0xff]  ;;  %v421_v12 = vadd.f32 %v2400_v22, %v2332_v29 }
  0x26   :  { %3951 = vst [vmem:[#allocation41_spill] sm:$0xff] %v2375_v60  ;;  %v2419_v7 = vld [vmem:[%s3730_s1 + $0x208] sm:$0xff]  ;;  %v205_v60 = vadd.f32 %v2424_v2, %v2317_v5  ;;  %v349_v26 = vadd.f32 %v2414_v13, %v2327_v18  ;;  %v2448_v29 = vmul.f32 0.05475029, %v493_v33  ;;  %v157_v5 = vmul.f32 0.0014794517, %v133_v14 }
  0x27   :  { %3952 = vst [vmem:[#allocation42_spill] sm:$0xff] %v2390_v6  ;;  %v277_v27 = vadd.f32 %v2419_v7, %v2322_v35  ;;  %v2446_v42 = vmul.f32 0.03320773, %v421_v12  ;;  %v398_v6 = vadd.f32 %v374_v49, %v326_v8  ;;  %v2451_v35 = vmul.f32 0.08077533, %v565_v28  ;;  %v12_v12 = vld [vmem:[%s3730_s1] sm:$0xff] }
  0x28   :  { %3953 = vst [vmem:[#allocation43_spill] sm:$0xff] %v2395_v4  ;;  %v687_v4 = vadd.f32 %v2176_v36, %v615_v39  ;;  %v229_v25 = vmul.f32 0.003804239, %v205_v60  ;;  %v2453_v18 = vmul.f32 0.106639, %v637_v24  ;;  %v2463_v8 = vld [vmem:[%s3730_s1 + $0x20] sm:$0xff] }
  0x29   :  { %3954 = vst [vmem:[#allocation44_spill] sm:$0xff] %v2400_v22  ;;  %v109_v22 = vmul.f32 0.133176, %v2365_v31  ;;  %v301_v59 = vmul.f32 0.008753463, %v277_v27  ;;  %v2483_v49 = vld [vmem:[%s3730_s1 + $0x60] sm:$0xff] }
  0x2a   :  { %3955 = vst [vmem:[#allocation45_spill] sm:$0xff] %v2414_v13  ;;  %v470_v13 = vadd.f32 %v446_v54, %v398_v6  ;;  %v2455_v36 = vmul.f32 0.1259791, %v709_v16  ;;  %v2473_v6 = vld [vmem:[%s3730_s1 + $0xc0] sm:$0xff]  ;;  %v2521_v33 = vmul.f32 0.05475029, %v499_v58 }
  0x2b   :  { %3956 = vst [vmem:[#allocation46_spill] sm:$0xff] %v2419_v7  ;;  %v373_v7 = vmul.f32 0.01802341, %v349_v26  ;;  %v181_v24 = vadd.f32 %v157_v5, %v109_v22  ;;  %v2488_v54 = vld [vmem:[%s3730_s1 + $0xe0] sm:$0xff]  ;;  %v2497_v26 = vadd.f32 %v2117_v11, %v2107_v9  ;;  %v2600_v11 = vmul.f32 0.08077533, %v2381_v3 }
  0x2c   :  { %3957 = vst [vmem:[#allocation47_spill] sm:$0xff] %v2424_v2  ;;  %v759_v2 = vadd.f32 %v2180_v38, %v687_v4  ;;  %v2468_v4 = vld [vmem:[%s3730_s1 + $0x40] sm:$0xff]  ;;  %v2477_v38 = vadd.f32 %v2288_v23, %v2190_v40  ;;  %v542_v27 = vadd.f32 %v2304_v32, %v470_v13  ;;  %v2525_v13 = vadd.f32 %v2270_v62, %v2208_v45 }
  0x2d   :  { %3958 = vst [vmem:[#allocation48_spill] sm:$0xff] %v2473_v6  ;;  %v2509_v60 = vld [vmem:[%s3730_s1 + $0x80] sm:$0xff]  ;;  %v253_v32 = vadd.f32 %v229_v25, %v181_v24  ;;  %v2548_v24 = vadd.f32 %v2265_v61, %v2213_v46 }
  0x2e   :  { %v787_v39 = vsel %vm785_vm0, %v759_v2, 0  ;;  %3959 = vst [vmem:[#allocation49_spill] sm:$0xff] %v2483_v49  ;;  %v2501_v2 = vadd.f32 %v2275_v63, %v2195_v41  ;;  %v2514_v22 = vld [vmem:[%s3730_s1 + $0x160] sm:$0xff]  ;;  %v614_v23 = vadd.f32 %v2306_v34, %v542_v27 }
  0x2f   :  { %3960 = vst [vmem:[#allocation50_spill] sm:$0xff] %v2488_v54  ;;  %v2503_v5 = vand.u32 4294901760, %v787_v39  ;;  %v2519_v16 = vld [vmem:[%s3730_s1 + $0x180] sm:$0xff]  ;;  %v636_v25 = vadd.f32 %v2514_v22, %v2488_v54  ;;  %v325_v27 = vadd.f32 %v301_v59, %v253_v32 }
  0x30   :  { %3961 = vst [vmem:[#allocation51_spill] sm:$0xff] %v2493_v21  ;;  %v2530_v28 = vld [vmem:[%s3730_s1 + $0x100] sm:$0xff]  ;;  %v564_v62 = vadd.f32 %v2519_v16, %v2473_v6  ;;  %v686_v59 = vadd.f32 %v2308_v17, %v614_v23 }
  0x31   :  { %3962 = vst [vmem:[#allocation52_spill] sm:$0xff] %v2503_v5  ;;  %v2535_v14 = vld [vmem:[%s3730_s1 + $0x1c0] sm:$0xff]  ;;  %802 = vmatpush.msra.mxu0 %v2503_v5  ;;  %v2552_v63 = vsub.f32 %v787_v39, %v2503_v5  ;;  %902 = vmatpush.msra.mxu3 %v2503_v5  ;;  %v108_v39 = vmul.f32 0.133176, %v2493_v21  ;;  %v397_v54 = vadd.f32 %v373_v7, %v325_v27  ;;  %v2616_v7 = vld [vmem:[%s3730_s1 + $0x278] sm:$0x3] }
  0x32   :  { %3963 = vst [vmem:[#allocation53_spill] sm:$0xff] %v2509_v60  ;;  %v2540_v58 = vld [vmem:[%s3730_s1 + $0x1e0] sm:$0xff]  ;;  %v758_v23 = vadd.f32 %v2312_v43, %v686_v59 }
  0x33   :  { %3964 = vst [vmem:[#allocation54_spill] sm:$0xff] %v2514_v22  ;;  %v2559_v45 = vld [vmem:[%s3730_s1 + $0x200] sm:$0xff]  ;;  %v348_v34 = vadd.f32 %v2540_v58, %v2483_v49  ;;  %873 = vmatpush.msra.mxu2 %v2552_v63  ;;  %v3809_v32 = vand.u32 4294901760, %v2552_v63 }
  0x34   :  { %3965 = vst [vmem:[#allocation55_spill] sm:$0xff] %v2519_v16  ;;  %v2564_v41 = vld [vmem:[%s3730_s1 + $0x220] sm:$0xff]  ;;  %v276_v21 = vadd.f32 %v2559_v45, %v2468_v4 }
  0x35   :  { %3966 = vst [vmem:[#allocation56_spill] sm:$0xff] %v2530_v28  ;;  %v2569_v61 = vld [vmem:[%s3730_s1 + $0x240] sm:$0xff]  ;;  %v204_v22 = vadd.f32 %v2564_v41, %v2463_v8 }
  0x36   :  { %3967 = vst [vmem:[#allocation57_spill] sm:$0xff] %v2535_v14  ;;  %v2577_v46 = vld [vmem:[%s3730_s1 + $0xa0] sm:$0xff]  ;;  %v132_v9 = vadd.f32 %v2569_v61, %v12_v12  ;;  %v420_v12 = vadd.f32 %v2535_v14, %v2509_v60  ;;  %v372_v14 = vmul.f32 0.01802341, %v348_v34 }
  0x37   :  { %3968 = vst [vmem:[#allocation58_spill] sm:$0xff] %v2540_v58  ;;  %v2582_v40 = vld [vmem:[%s3730_s1 + $0x1a0] sm:$0xff]  ;;  %v228_v6 = vmul.f32 0.003804239, %v204_v22 }
  0x38   :  { %3969 = vst [vmem:[#allocation59_spill] sm:$0xff] %v2559_v45  ;;  %v2595_v16 = vld [vmem:[%s3730_s1 + $0x140] sm:$0xff]  ;;  %v156_v5 = vmul.f32 0.0014794517, %v132_v9  ;;  %v833_v45 = vsub.f32 %v2552_v63, %v3809_v32  ;;  %v492_v3 = vadd.f32 %v2582_v40, %v2577_v46 }
  0x39   :  { %3970 = vst [vmem:[#allocation60_spill] sm:$0xff] %v2564_v41  ;;  %v708_v58 = vadd.f32 %v2595_v16, %v2530_v28  ;;  %v780_v17 = vld [vmem:[%s3729_s0] sm:$0xff] }
  0x3a   :  { %3971 = vst [vmem:[#allocation61_spill] sm:$0xff] %v2569_v61 }
  0x3b   :  { %3972 = vst [vmem:[#allocation62_spill] sm:$0xff] %v2577_v46 }
  0x3c   :  { %3973 = vst [vmem:[#allocation63_spill] sm:$0xff] %v2582_v40 }
  0x3d   :  { %3974 = vst [vmem:[#allocation64_spill] sm:$0xff] %v2595_v16 }
  0x3e   :  { %3975 = vst [vmem:[#allocation65_spill] sm:$0xff] %v2616_v7 }
  0x3f   :  { %7 = vsyncpa [#allocation3], 0  ;;  %v469_v9 = vadd.f32 %v2446_v42, %v397_v54  ;;  %v180_v22 = vadd.f32 %v156_v5, %v108_v39  ;;  %v300_v27 = vmul.f32 0.008753463, %v276_v21  ;;  %v444_v28 = vmul.f32 0.03320773, %v420_v12 }
  0x40   :  { %v2619_v43 = vand.u32 4294901760, %v758_v23  ;;  %v834_v59 = vand.u32 4294901760, %v833_v45  ;;  %v588_v60 = vmul.f32 0.08077533, %v564_v62  ;;  %v660_v32 = vmul.f32 0.106639, %v636_v25 }
  0x41   :  { %v541_v34 = vadd.f32 %v2448_v29, %v469_v9  ;;  %v252_v41 = vadd.f32 %v228_v6, %v180_v22  ;;  %v783_v40 = vsel %vm781_vm1, %v780_v17, 0  ;;  %v139_v46 = vadd.f32 %v2616_v7, %v2064_v0  ;;  %v2628_v42 = vld [vmem:[%s3730_s1 + $0x270] sm:$0xff]  ;;  %s1931_s5 = sshll.u32 %s3731_s2, 4  ;;  %s2044_s6 = smov 128   ;;  %s1932_s5 = int_to_ptr.hbm [resolvable:$true] %s1931_s5 }
  0x42   :  { %804 = vmatpush.msra.mxu0 %v2619_v43  ;;  %v2632_v54 = vsub.f32 %v758_v23, %v2619_v43  ;;  %904 = vmatpush.msra.mxu3 %v2619_v43  ;;  %v516_v45 = vmul.f32 0.05475029, %v492_v3  ;;  %v732_v62 = vmul.f32 0.1259791, %v708_v58  ;;  %v2635_v29 = vand.u32 4294901760, %v783_v40  ;;  %s2045_s7 = smov 8  }
  0x43   :  { %v613_v6 = vadd.f32 %v2451_v35, %v541_v34  ;;  %835 = vmatpush.msra.mxu1 %v834_v59  ;;  %v324_v0 = vadd.f32 %v300_v27, %v252_v41  ;;  %v163_v21 = vmul.f32 0.0014794517, %v139_v46  ;;  %v2639_v5 = vmul.f32 0.106639, %v2408_v19 }
  0x44   :  { %876 = vmatpush.msra.mxu2 %v2632_v54  ;;  %v3816_v25 = vand.u32 4294901760, %v2632_v54  ;;  %v2644_v39 = vsub.f32 %v783_v40, %v2635_v29  ;;  %v114_v12 = vmul.f32 0.133176, %v2238_v52  ;;  %v138_v58 = vadd.f32 %v2628_v42, %v2203_v44 }
  0x45   :  { %v685_v35 = vadd.f32 %v2453_v18, %v613_v6  ;;  %v396_v17 = vadd.f32 %v372_v14, %v324_v0  ;;  %v187_v41 = vadd.f32 %v163_v21, %v2221_v48  ;;  %v2652_v46 = vmul.f32 0.1259791, %v2497_v26 }
  0x46   :  { %3976 = vst [vmem:[#allocation66_spill] sm:$0xff] %v2644_v39  ;;  %v839_v19 = vsub.f32 %v2632_v54, %v3816_v25  ;;  %v2658_v40 = vand.u32 4294901760, %v2644_v39  ;;  %v162_v23 = vmul.f32 0.0014794517, %v138_v58  ;;  %v234_v3 = vmul.f32 0.003804239, %v2385_v30 }
  0x47   :  { %v757_v44 = vadd.f32 %v2455_v36, %v685_v35  ;;  %v468_v9 = vadd.f32 %v444_v28, %v396_v17  ;;  %v259_v18 = vadd.f32 %v2240_v53, %v187_v41  ;;  %v306_v48 = vmul.f32 0.008753463, %v2477_v38 }
  0x48   :  { %3977 = vst [vmem:[#allocation67_spill] sm:$0xff] %v2658_v40  ;;  %v840_v14 = vand.u32 4294901760, %v839_v19  ;;  %v812_v26 = vsub.f32 %v2644_v39, %v2658_v40  ;;  %v186_v22 = vadd.f32 %v162_v23, %v114_v12  ;;  %v378_v27 = vmul.f32 0.01802341, %v2501_v2  ;;  %v2679_v2 = vld [vmem:[%s3730_s1 + $0x268] sm:$0xff] }
  0x49   :  { %v2667_v59 = vand.u32 4294901760, %v757_v44  ;;  %v540_v34 = vadd.f32 %v516_v45, %v468_v9  ;;  %v331_v6 = vadd.f32 %v2283_v20, %v259_v18  ;;  %v570_v30 = vadd.f32 %v2255_v57, %v2218_v47  ;;  %v3979_v19 = vld [vmem:[#allocation32_spill] sm:$0xff]  ;;  %v3982_v9 = vld [vmem:[#allocation47_spill] sm:$0xff] }
  0x4a   :  { %841 = vmatpush.msra.mxu1 %v840_v14  ;;  %v258_v36 = vadd.f32 %v234_v3, %v186_v22  ;;  %v450_v53 = vmul.f32 0.03320773, %v2525_v13  ;;  %v522_v38 = vmul.f32 0.05475029, %v2548_v24  ;;  %v642_v28 = vadd.f32 %v2250_v56, %v2228_v50  ;;  %v3980_v3 = vld [vmem:[#allocation33_spill] sm:$0xff]  ;;  %v3984_v14 = vld [vmem:[#allocation46_spill] sm:$0xff] }
  0x4b   :  { %806 = vmatpush.msra.mxu0 %v2667_v59  ;;  %v2683_v20 = vsub.f32 %v757_v44, %v2667_v59  ;;  %906 = vmatpush.msra.mxu3 %v2667_v59  ;;  %v612_v45 = vadd.f32 %v588_v60, %v540_v34  ;;  %v2686_v0 = vand.u32 4294901760, %v812_v26  ;;  %v403_v13 = vadd.f32 %v2357_v10, %v331_v6  ;;  %v3981_v44 = vld [vmem:[#allocation34_spill] sm:$0xff] }
  0x4c   :  { %v330_v24 = vadd.f32 %v306_v48, %v258_v36  ;;  %v594_v21 = vmul.f32 0.08077533, %v570_v30  ;;  %v714_v12 = vadd.f32 %v2245_v55, %v2233_v51  ;;  %v113_v58 = vmul.f32 0.133176, %v2370_v37  ;;  %v3983_v48 = vld [vmem:[#allocation35_spill] sm:$0xff]  ;;  %v3985_v37 = vld [vmem:[#allocation36_spill] sm:$0xff] }
  0x4d   :  { %3978 = vst [vmem:[#allocation68_spill] sm:$0xff] %v2686_v0  ;;  %879 = vmatpush.msra.mxu2 %v2683_v20  ;;  %v684_v35 = vadd.f32 %v660_v32, %v612_v45  ;;  %v475_v17 = vadd.f32 %v2377_v15, %v403_v13  ;;  %v844_v41 = vand.u32 4294901760, %v2683_v20  ;;  %v137_v60 = vadd.f32 %v2679_v2, %v3979_v19 }
  0x4e   :  { %v402_v23 = vadd.f32 %v378_v27, %v330_v24  ;;  %v209_v10 = vadd.f32 %v2435_v1, %v3980_v3  ;;  %v281_v18 = vadd.f32 %v3982_v9, %v3981_v44  ;;  %v353_v26 = vadd.f32 %v3984_v14, %v3983_v48  ;;  %v3986_v9 = vld [vmem:[#allocation45_spill] sm:$0xff] }
  0x4f   :  { %v756_v22 = vadd.f32 %v732_v62, %v684_v35  ;;  %v547_v32 = vadd.f32 %v2521_v33, %v475_v17  ;;  %v845_v15 = vsub.f32 %v2683_v20, %v844_v41  ;;  %v161_v34 = vmul.f32 0.0014794517, %v137_v60  ;;  %v3987_v62 = vld [vmem:[#allocation37_spill] sm:$0xff]  ;;  %v3988_v35 = vld [vmem:[#allocation44_spill] sm:$0xff]  ;;  %v3989_v17 = vld [vmem:[#allocation38_spill] sm:$0xff] }
  0x50   :  { %v474_v6 = vadd.f32 %v450_v53, %v402_v23  ;;  %v666_v30 = vmul.f32 0.106639, %v642_v28  ;;  %v233_v36 = vmul.f32 0.003804239, %v209_v10  ;;  %v305_v45 = vmul.f32 0.008753463, %v281_v18 }
  0x51   :  { %v2705_v27 = vand.u32 4294901760, %v756_v22  ;;  %v619_v13 = vadd.f32 %v2600_v11, %v547_v32  ;;  %v846_v24 = vand.u32 4294901760, %v845_v15  ;;  %v185_v19 = vadd.f32 %v161_v34, %v113_v58  ;;  %v3990_v20 = vld [vmem:[#allocation43_spill] sm:$0xff]  ;;  %v3993_v34 = vld [vmem:[#allocation42_spill] sm:$0xff] }
  0x52   :  { %v546_v25 = vadd.f32 %v522_v38, %v474_v6  ;;  %v425_v14 = vadd.f32 %v3986_v9, %v3985_v37  ;;  %v497_v33 = vadd.f32 %v3988_v35, %v3987_v62  ;;  %v569_v60 = vadd.f32 %v3990_v20, %v3989_v17  ;;  %v2721_v38 = vld [vmem:[%s3730_s1 + $0x260] sm:$0xff] }
  0x53   :  { %808 = vmatpush.msra.mxu0 %v2705_v27  ;;  %v849_v53 = vsub.f32 %v756_v22, %v2705_v27  ;;  %908 = vmatpush.msra.mxu3 %v2705_v27  ;;  %v691_v11 = vadd.f32 %v2639_v5, %v619_v13  ;;  %v257_v28 = vadd.f32 %v233_v36, %v185_v19  ;;  %v377_v58 = vmul.f32 0.01802341, %v353_v26  ;;  %v3992_v15 = vld [vmem:[#allocation39_spill] sm:$0xff] }
  0x54   :  { %3991 = vst [vmem:[#allocation32_spill] sm:$0xff] %v2721_v38  ;;  %814 = vmatmul.f32.vlgmr.msra.gmra.mxu0 %v2686_v0  ;;  %912 = vmatmul.f32.vlgmr.msra.gmra.mxu3 %v2658_v40  ;;  %v618_v23 = vadd.f32 %v594_v21, %v546_v25  ;;  %v738_v10 = vmul.f32 0.1259791, %v714_v12  ;;  %v449_v18 = vmul.f32 0.03320773, %v425_v14  ;;  %v641_v6 = vadd.f32 %v3993_v34, %v3992_v15 }
  0x55   :  { %v112_v22 = vmul.f32 0.133176, %v2595_v16  ;;  %882 = vmatpush.msra.mxu2 %v849_v53  ;;  %v763_v32 = vadd.f32 %v2652_v46, %v691_v11  ;;  %847 = vmatpush.msra.mxu1 %v846_v24  ;;  %v850_v5 = vand.u32 4294901760, %v849_v53  ;;  %v329_v26 = vadd.f32 %v305_v45, %v257_v28  ;;  %v3995_v45 = vld [vmem:[#allocation41_spill] sm:$0xff] }
  0x56   :  { %885 = vmatmul.f32.vlgmr.msra.gmra.mxu2 %v2644_v39  ;;  %v3994_v36 = vand.u32 4294901760, %v2552_v63  ;;  %v690_v13 = vadd.f32 %v666_v30, %v618_v23  ;;  %v521_v25 = vmul.f32 0.05475029, %v497_v33  ;;  %v593_v21 = vmul.f32 0.08077533, %v569_v60  ;;  %v3997_v23 = vld [vmem:[#allocation60_spill] sm:$0xff] }
  0x57   :  { %v136_v12 = vadd.f32 %v2721_v38, %v2463_v8  ;;  %v976_v14 = vsel %vm785_vm0, %v763_v32, 0  ;;  %v851_v46 = vsub.f32 %v849_v53, %v850_v5  ;;  %v401_v24 = vadd.f32 %v377_v58, %v329_v26  ;;  %v4019_v38 = vld [vmem:[#allocation20_spill] sm:$0xff] }
  0x58   :  { %931 = vmatpush.msrb.mxu0 %v3994_v36  ;;  %v713_v19 = vadd.f32 %v3995_v45, %v2365_v31  ;;  %v2737_v11 = vand.u32 4294901760, %v976_v14  ;;  %v762_v28 = vadd.f32 %v738_v10, %v690_v13  ;;  %v3996_v16 = vand.u32 4294901760, %v2632_v54  ;;  %v4000_v10 = vld [vmem:[#allocation59_spill] sm:$0xff]  ;;  %v4001_v13 = vld [vmem:[#allocation62_spill] sm:$0xff] }
  0x59   :  { %v665_v63 = vmul.f32 0.106639, %v641_v6  ;;  %v160_v30 = vmul.f32 0.0014794517, %v136_v12  ;;  %v852_v33 = vand.u32 4294901760, %v851_v46  ;;  %v473_v60 = vadd.f32 %v449_v18, %v401_v24  ;;  %v4002_v12 = vld [vmem:[#allocation58_spill] sm:$0xff] }
  0x5a   :  { %935 = vmatpush.msrb.mxu0 %v3996_v16  ;;  %v208_v8 = vadd.f32 %v2569_v61, %v2468_v4  ;;  %v280_v53 = vadd.f32 %v3997_v23, %v2483_v49  ;;  %991 = vmatpush.msrb.mxu2 %v2737_v11  ;;  %v2747_v58 = vsub.f32 %v976_v14, %v2737_v11  ;;  %v2749_v32 = vand.u32 4294901760, %v762_v28  ;;  %v3999_v16 = vld [vmem:[#allocation53_spill] sm:$0xff] }
  0x5b   :  { %v184_v54 = vadd.f32 %v160_v30, %v112_v22  ;;  %v352_v26 = vadd.f32 %v4000_v10, %v3999_v16  ;;  %853 = vmatpush.msra.mxu1 %v852_v33  ;;  %v545_v18 = vadd.f32 %v521_v25, %v473_v60  ;;  %v424_v46 = vadd.f32 %v4002_v12, %v4001_v13  ;;  %v4003_v22 = vld [vmem:[#allocation48_spill] sm:$0xff]  ;;  %v4004_v30 = vld [vmem:[#allocation57_spill] sm:$0xff]  ;;  %v4007_v12 = vld [vmem:[#allocation63_spill] sm:$0xff] }
  0x5c   :  { %3998 = vst [vmem:[#allocation33_spill] sm:$0xff] %v2749_v32  ;;  %939 = vmatpush.msrb.mxu0 %v844_v41  ;;  %v232_v6 = vmul.f32 0.003804239, %v208_v8  ;;  %v304_v36 = vmul.f32 0.008753463, %v280_v53  ;;  %v3820_v24 = vand.u32 4294901760, %v2747_v58  ;;  %993 = vmatpush.msrb.mxu2 %v2749_v32  ;;  %v2758_v14 = vsub.f32 %v762_v28, %v2749_v32 }
  0x5d   :  { %855 = vmatmul.f32.vlgmr.msra.gmra.mxu1 %v2635_v29  ;;  %v737_v41 = vmul.f32 0.1259791, %v713_v19  ;;  %v496_v10 = vadd.f32 %v4004_v30, %v4003_v22  ;;  %v4005_v33 = vld [vmem:[#allocation52_spill] sm:$0xff]  ;;  %v617_v25 = vadd.f32 %v593_v21, %v545_v18  ;;  %v376_v8 = vmul.f32 0.01802341, %v352_v26  ;;  %v4006_v53 = vld [vmem:[#allocation50_spill] sm:$0xff] }
  0x5e   :  { %962 = vmatpush.msrb.mxu1 %v4005_v33  ;;  %v256_v60 = vadd.f32 %v232_v6, %v184_v54  ;;  %v568_v23 = vadd.f32 %v4007_v12, %v4006_v53  ;;  %943 = vmatpush.msrb.mxu0 %v850_v5  ;;  %v2769_v28 = vld [vmem:[%s3730_s1 + $0x298] sm:$0x3]  ;;  %v1022_v19 = vsub.f32 %v2747_v58, %v3820_v24  ;;  %v3823_v30 = vand.u32 4294901760, %v2758_v14  ;;  %v4010_v6 = vld [vmem:[#allocation56_spill] sm:$0xff]  ;;  %v4011_v33 = vld [vmem:[#allocation55_spill] sm:$0xff] }
  0x5f   :  { %4008 = vst [vmem:[#allocation34_spill] sm:$0xff] %v2769_v28  ;;  %v448_v22 = vmul.f32 0.03320773, %v424_v46  ;;  %945 = vmatmul.f32.vlgmr.msrb.gmra.mxu0 %v2635_v29  ;;  %v4009_v21 = vld [vmem:[#allocation14_spill] sm:$0xff]  ;;  %v689_v26 = vadd.f32 %v665_v63, %v617_v25  ;;  %v520_v18 = vmul.f32 0.05475029, %v496_v10  ;;  %v640_v12 = vadd.f32 %v4011_v33, %v4010_v6 }
  0x60   :  { %v119_v54 = vmul.f32 0.133176, %v4009_v21  ;;  %964 = vmatpush.msrb.mxu1 %v2619_v43  ;;  %v328_v5 = vadd.f32 %v304_v36, %v256_v60  ;;  %1062 = vmatpush.msra.mxu0 %v2747_v58  ;;  %v1023_v53 = vand.u32 4294901760, %v1022_v19  ;;  %v1028_v24 = vsub.f32 %v2758_v14, %v3823_v30  ;;  %v4012_v46 = vld [vmem:[#allocation51_spill] sm:$0xff]  ;;  %v4013_v13 = vld [vmem:[#allocation54_spill] sm:$0xff]  ;;  %v4014_v16 = vld [vmem:[#allocation5_spill] sm:$0xff] }
  0x61   :  { %v712_v61 = vadd.f32 %v4013_v13, %v4012_v46  ;;  %v143_v63 = vadd.f32 %v2769_v28, %v4014_v16  ;;  %v761_v25 = vadd.f32 %v737_v41, %v689_v26  ;;  %v592_v36 = vmul.f32 0.08077533, %v568_v23  ;;  %v4015_v10 = vld [vmem:[#allocation6_spill] sm:$0xff]  ;;  %v4016_v30 = vld [vmem:[#allocation7_spill] sm:$0xff]  ;;  %v4017_v33 = vld [vmem:[#allocation21_spill] sm:$0xff] }
  0x62   :  { %v400_v43 = vadd.f32 %v376_v8, %v328_v5  ;;  %966 = vmatpush.msrb.mxu1 %v2667_v59  ;;  %1065 = vmatpush.msra.mxu0 %v2758_v14  ;;  %v215_v60 = vadd.f32 %v2616_v7, %v4015_v10  ;;  %v1029_v19 = vand.u32 4294901760, %v1028_v24  ;;  %v287_v6 = vadd.f32 %v4017_v33, %v4016_v30  ;;  %v4018_v46 = vld [vmem:[#allocation8_spill] sm:$0xff]  ;;  %v4021_v23 = vld [vmem:[#allocation9_spill] sm:$0xff]  ;;  %v4022_v8 = vld [vmem:[#allocation19_spill] sm:$0xff] }
  0x63   :  { %1024 = vmatpush.msrb.mxu3 %v1023_v53  ;;  %v167_v21 = vmul.f32 0.0014794517, %v143_v63  ;;  %v359_v49 = vadd.f32 %v4019_v38, %v4018_v46  ;;  %v2796_v16 = vand.u32 4294901760, %v761_v25  ;;  %v431_v26 = vadd.f32 %v4022_v8, %v4021_v23  ;;  %v4023_v5 = vld [vmem:[#allocation10_spill] sm:$0xff]  ;;  %v2812_v46 = vld [vmem:[%s3730_s1 + $0x290] sm:$0xff]  ;;  %v4026_v10 = vld [vmem:[#allocation11_spill] sm:$0xff] }
  0x64   :  { %v472_v41 = vadd.f32 %v448_v22, %v400_v43  ;;  %968 = vmatpush.msrb.mxu1 %v2705_v27  ;;  %v239_v59 = vmul.f32 0.003804239, %v215_v60  ;;  %v311_v53 = vmul.f32 0.008753463, %v287_v6  ;;  %v4024_v63 = vld [vmem:[#allocation18_spill] sm:$0xff]  ;;  %4025 = vst [vmem:[#allocation36_spill] sm:$0xff] %v2812_v46 }
  0x65   :  { %4020 = vst [vmem:[#allocation35_spill] sm:$0xff] %v2796_v16  ;;  %1030 = vmatpush.msrb.mxu3 %v1029_v19  ;;  %970 = vmatmul.f32.vlgmr.msrb.gmra.mxu1 %v2635_v29  ;;  %v191_v24 = vadd.f32 %v167_v21, %v119_v54  ;;  %v503_v30 = vadd.f32 %v4024_v63, %v4023_v5  ;;  %v664_v33 = vmul.f32 0.106639, %v640_v12  ;;  %v736_v27 = vmul.f32 0.1259791, %v712_v61  ;;  %v4027_v60 = vld [vmem:[#allocation17_spill] sm:$0xff] }
  0x66   :  { %995 = vmatpush.msrb.mxu2 %v2796_v16  ;;  %v2806_v38 = vsub.f32 %v761_v25, %v2796_v16  ;;  %v544_v22 = vadd.f32 %v520_v18, %v472_v41  ;;  %1091 = vmatpush.msra.mxu1 %v2737_v11  ;;  %v383_v6 = vmul.f32 0.01802341, %v359_v49  ;;  %v455_v43 = vmul.f32 0.03320773, %v431_v26  ;;  %v4028_v12 = vld [vmem:[#allocation12_spill] sm:$0xff]  ;;  %v4030_v8 = vld [vmem:[#allocation13_spill] sm:$0xff] }
  0x67   :  { %v263_v54 = vadd.f32 %v239_v59, %v191_v24  ;;  %v575_v19 = vadd.f32 %v4027_v60, %v4026_v10  ;;  %v527_v61 = vmul.f32 0.05475029, %v503_v30  ;;  %v4029_v18 = vld [vmem:[#allocation16_spill] sm:$0xff]  ;;  %v4031_v5 = vld [vmem:[#allocation15_spill] sm:$0xff]  ;;  %v118_v49 = vmul.f32 0.133176, %v2245_v55 }
  0x68   :  { %v3834_v21 = vand.u32 4294901760, %v2806_v38  ;;  %v616_v25 = vadd.f32 %v592_v36, %v544_v22  ;;  %1068 = vmatpush.msra.mxu0 %v2806_v38  ;;  %1093 = vmatpush.msra.mxu1 %v2749_v32  ;;  %v647_v41 = vadd.f32 %v4029_v18, %v4028_v12  ;;  %v719_v59 = vadd.f32 %v4031_v5, %v4030_v8  ;;  %v4032_v26 = vld [vmem:[#allocation22_spill] sm:$0xff]  ;;  %v4033_v30 = vld [vmem:[#allocation23_spill] sm:$0xff]  ;;  %v4034_v10 = vld [vmem:[#allocation24_spill] sm:$0xff] }
  0x69   :  { %v335_v23 = vadd.f32 %v311_v53, %v263_v54  ;;  %v142_v24 = vadd.f32 %v2812_v46, %v4032_v26  ;;  %v214_v22 = vadd.f32 %v2628_v42, %v4033_v30  ;;  %v4035_v53 = vld [vmem:[#allocation31_spill] sm:$0xff]  ;;  %v4036_v18 = vld [vmem:[#allocation25_spill] sm:$0xff]  ;;  %v4037_v55 = vld [vmem:[#allocation30_spill] sm:$0xff] }
  0x6a   :  { %v1034_v36 = vsub.f32 %v2806_v38, %v3834_v21  ;;  %v688_v63 = vadd.f32 %v664_v33, %v616_v25  ;;  %1095 = vmatpush.msra.mxu1 %v2796_v16  ;;  %v286_v54 = vadd.f32 %v4035_v53, %v4034_v10  ;;  %v358_v8 = vadd.f32 %v4037_v55, %v4036_v18  ;;  %v4038_v5 = vld [vmem:[#allocation26_spill] sm:$0xff]  ;;  %v4039_v26 = vld [vmem:[#allocation29_spill] sm:$0xff]  ;;  %v2845_v53 = vld [vmem:[%s3730_s1 + $0x288] sm:$0xff] }
  0x6b   :  { %v407_v60 = vadd.f32 %v383_v6, %v335_v23  ;;  %v166_v12 = vmul.f32 0.0014794517, %v142_v24  ;;  %v430_v46 = vadd.f32 %v4039_v26, %v4038_v5  ;;  %v599_v21 = vmul.f32 0.08077533, %v575_v19  ;;  %v4040_v23 = vld [vmem:[#allocation28_spill] sm:$0xff]  ;;  %4041 = vst [vmem:[#allocation45_spill] sm:$0xff] %v2845_v53 }
  0x6c   :  { %v1035_v7 = vand.u32 4294901760, %v1034_v36  ;;  %v760_v28 = vadd.f32 %v736_v27, %v688_v63  ;;  %v238_v33 = vmul.f32 0.003804239, %v214_v22  ;;  %v671_v16 = vmul.f32 0.106639, %v647_v41 }
  0x6d   :  { %v479_v25 = vadd.f32 %v455_v43, %v407_v60  ;;  %v190_v32 = vadd.f32 %v166_v12, %v118_v49  ;;  %v310_v13 = vmul.f32 0.008753463, %v286_v54  ;;  %v743_v10 = vmul.f32 0.1259791, %v719_v59  ;;  %v4042_v43 = vld [vmem:[#allocation27_spill] sm:$0xff] }
  0x6e   :  { %1036 = vmatpush.msrb.mxu3 %v1035_v7  ;;  %v2838_v30 = vand.u32 4294901760, %v760_v28  ;;  %v382_v6 = vmul.f32 0.01802341, %v358_v8  ;;  %v502_v24 = vadd.f32 %v4040_v23, %v2218_v47  ;;  %v454_v36 = vmul.f32 0.03320773, %v430_v46 }
  0x6f   :  { %v551_v27 = vadd.f32 %v527_v61, %v479_v25  ;;  %v262_v19 = vadd.f32 %v238_v33, %v190_v32  ;;  %v574_v41 = vadd.f32 %v4042_v43, %v2228_v50  ;;  %v646_v47 = vadd.f32 %v2255_v57, %v2233_v51 }
  0x70   :  { %997 = vmatpush.msrb.mxu2 %v2838_v30  ;;  %v1038_v7 = vsub.f32 %v760_v28, %v2838_v30  ;;  %1097 = vmatpush.msra.mxu1 %v2838_v30  ;;  %v718_v59 = vadd.f32 %v2250_v56, %v2238_v52  ;;  %v117_v49 = vmul.f32 0.133176, %v3995_v45  ;;  %v526_v61 = vmul.f32 0.05475029, %v502_v24  ;;  %v4044_v56 = vld [vmem:[#allocation47_spill] sm:$0xff] }
  0x71   :  { %1003 = vmatmul.f32.vlgmr.msrb.gmra.mxu2 %v2686_v0  ;;  %v623_v32 = vadd.f32 %v599_v21, %v551_v27  ;;  %v334_v46 = vadd.f32 %v310_v13, %v262_v19  ;;  %1101 = vmatmul.f32.vlgmr.msra.gmra.mxu1 %v2658_v40  ;;  %v141_v50 = vadd.f32 %v2845_v53, %v3980_v3  ;;  %v4043_v63 = vand.u32 4294901760, %v2747_v58  ;;  %v4045_v3 = vld [vmem:[#allocation46_spill] sm:$0xff] }
  0x72   :  { %v1039_v28 = vand.u32 4294901760, %v1038_v7  ;;  %1071 = vmatpush.msra.mxu0 %v1038_v7  ;;  %v213_v51 = vadd.f32 %v2679_v2, %v3981_v44  ;;  %v285_v52 = vadd.f32 %v2435_v1, %v3983_v48  ;;  %v357_v57 = vadd.f32 %v4044_v56, %v3985_v37  ;;  %v2877_v37 = vld [vmem:[%s3730_s1 + $0x280] sm:$0xff]  ;;  %v4058_v56 = vld [vmem:[#allocation48_spill] sm:$0xff] }
  0x73   :  { %1120 = vmatpush.msra.mxu2 %v4043_v63  ;;  %1074 = vmatmul.f32.vlgmr.msra.gmra.mxu0 %v2644_v39  ;;  %v695_v45 = vadd.f32 %v671_v16, %v623_v32  ;;  %v406_v13 = vadd.f32 %v382_v6, %v334_v46  ;;  %v165_v21 = vmul.f32 0.0014794517, %v141_v50  ;;  %v429_v22 = vadd.f32 %v4045_v3, %v3987_v62  ;;  %v4054_v32 = vld [vmem:[#allocation61_spill] sm:$0xff]  ;;  %v4056_v50 = vld [vmem:[#allocation60_spill] sm:$0xff] }
  0x74   :  { %v1040_v58 = vsub.f32 %v1038_v7, %v1039_v28  ;;  %v4046_v54 = vand.u32 4294901760, %v2758_v14  ;;  %v598_v60 = vmul.f32 0.08077533, %v574_v41  ;;  %v670_v44 = vmul.f32 0.106639, %v646_v47  ;;  %4047 = vst [vmem:[#allocation37_spill] sm:$0xff] %v2877_v37 }
  0x75   :  { %v237_v12 = vmul.f32 0.003804239, %v213_v51  ;;  %v767_v18 = vadd.f32 %v743_v10, %v695_v45  ;;  %v478_v48 = vadd.f32 %v454_v36, %v406_v13  ;;  %v189_v55 = vadd.f32 %v165_v21, %v117_v49  ;;  %v4049_v36 = vld [vmem:[#allocation40_spill] sm:$0xff]  ;;  %v4053_v49 = vld [vmem:[#allocation53_spill] sm:$0xff] }
  0x76   :  { %1124 = vmatpush.msra.mxu2 %v4046_v54  ;;  %v309_v8 = vmul.f32 0.008753463, %v285_v52  ;;  %v1041_v16 = vand.u32 4294901760, %v1040_v58  ;;  %v4048_v5 = vand.u32 4294901760, %v2806_v38  ;;  %v742_v62 = vmul.f32 0.1259791, %v718_v59 }
  0x77   :  { %v381_v26 = vmul.f32 0.01802341, %v357_v57  ;;  %v501_v14 = vadd.f32 %v3986_v9, %v3989_v17  ;;  %v1166_v33 = vsel %vm785_vm0, %v767_v18, 0  ;;  %v550_v25 = vadd.f32 %v526_v61, %v478_v48  ;;  %v4052_v41 = vld [vmem:[#allocation32_spill] sm:$0xff]  ;;  %v4055_v61 = vld [vmem:[#allocation62_spill] sm:$0xff]  ;;  %v4059_v57 = vld [vmem:[#allocation59_spill] sm:$0xff] }
  0x78   :  { %1128 = vmatpush.msra.mxu2 %v4048_v5  ;;  %v261_v10 = vadd.f32 %v237_v12, %v189_v55  ;;  %v453_v6 = vmul.f32 0.03320773, %v429_v22  ;;  %1042 = vmatpush.msrb.mxu3 %v1041_v16  ;;  %v2884_v23 = vand.u32 4294901760, %v1166_v33  ;;  %v573_v24 = vadd.f32 %v3988_v35, %v3992_v15  ;;  %v4051_v15 = vld [vmem:[#allocation49_spill] sm:$0xff]  ;;  %v4060_v58 = vld [vmem:[#allocation35_spill] sm:$0xff]  ;;  %v4061_v12 = vld [vmem:[#allocation50_spill] sm:$0xff] }
  0x79   :  { %v645_v38 = vadd.f32 %v3990_v20, %v2365_v31  ;;  %v140_v27 = vadd.f32 %v2877_v37, %v2468_v4  ;;  %1044 = vmatmul.f32.vlgmr.msrb.gmra.mxu3 %v2635_v29  ;;  %v622_v9 = vadd.f32 %v598_v60, %v550_v25  ;;  %v525_v19 = vmul.f32 0.05475029, %v501_v14  ;;  %v4050_v31 = vld [vmem:[#allocation54_spill] sm:$0xff]  ;;  %v4063_v25 = vld [vmem:[#allocation56_spill] sm:$0xff] }
  0x7a   :  { %1132 = vmatpush.msra.mxu2 %v1039_v28  ;;  %v333_v17 = vadd.f32 %v309_v8, %v261_v10  ;;  %v717_v43 = vadd.f32 %v3993_v34, %v4049_v36  ;;  %1151 = vmatpush.msra.mxu3 %v2737_v11  ;;  %v2898_v35 = vsub.f32 %v1166_v33, %v2884_v23  ;;  %v116_v20 = vmul.f32 0.133176, %v4050_v31  ;;  %v4057_v11 = vld [vmem:[#allocation33_spill] sm:$0xff]  ;;  %v4062_v18 = vld [vmem:[#allocation58_spill] sm:$0xff]  ;;  %v4067_v36 = vld [vmem:[#allocation64_spill] sm:$0xff] }
  0x7b   :  { %1134 = vmatmul.f32.vlgmr.msra.gmra.mxu2 %v2635_v29  ;;  %1181 = vmatpush.msrb.mxu0 %v2884_v23  ;;  %v164_v4 = vmul.f32 0.0014794517, %v140_v27  ;;  %v212_v7 = vadd.f32 %v4052_v41, %v4051_v15  ;;  %v694_v47 = vadd.f32 %v670_v44, %v622_v9  ;;  %v284_v46 = vadd.f32 %v4054_v32, %v4053_v49  ;;  %v2922_v55 = vld [vmem:[%s3730_s1 + $0x2b8] sm:$0x3]  ;;  %v4064_v10 = vld [vmem:[#allocation57_spill] sm:$0xff] }
  0x7c   :  { %v405_v59 = vadd.f32 %v381_v26, %v333_v17  ;;  %v356_v28 = vadd.f32 %v4056_v50, %v4055_v61  ;;  %1153 = vmatpush.msra.mxu3 %v4057_v11  ;;  %1252 = vmatpush.msrb.mxu2 %v2898_v35  ;;  %v3838_v63 = vand.u32 4294901760, %v2898_v35  ;;  %v428_v45 = vadd.f32 %v4059_v57, %v4058_v56  ;;  %v4065_v17 = vld [vmem:[#allocation51_spill] sm:$0xff]  ;;  %v4070_v11 = vld [vmem:[#allocation34_spill] sm:$0xff]  ;;  %v4071_v56 = vld [vmem:[#allocation65_spill] sm:$0xff] }
  0x7d   :  { %v188_v51 = vadd.f32 %v164_v4, %v116_v20  ;;  %v236_v52 = vmul.f32 0.003804239, %v212_v7  ;;  %v766_v13 = vadd.f32 %v742_v62, %v694_v47  ;;  %v597_v3 = vmul.f32 0.08077533, %v573_v24  ;;  %v2942_v20 = vld [vmem:[%s3730_s1 + $0x198] sm:$0x3] }
  0x7e   :  { %v477_v21 = vadd.f32 %v453_v6, %v405_v59  ;;  %v308_v22 = vmul.f32 0.008753463, %v284_v46  ;;  %1155 = vmatpush.msra.mxu3 %v4060_v58  ;;  %v1212_v54 = vsub.f32 %v2898_v35, %v3838_v63  ;;  %v380_v44 = vmul.f32 0.01802341, %v356_v28  ;;  %4069 = vst [vmem:[#allocation44_spill] sm:$0xff] %v2942_v20 }
  0x7f   :  { %v260_v60 = vadd.f32 %v236_v52, %v188_v51  ;;  %v500_v48 = vadd.f32 %v4062_v18, %v4061_v12  ;;  %v2924_v8 = vand.u32 4294901760, %v766_v13  ;;  %v669_v5 = vmul.f32 0.106639, %v645_v38  ;;  %v4066_v38 = vld [vmem:[#allocation63_spill] sm:$0xff]  ;;  %v1947_v7 = vld [vmem:[%s3730_s1 + $0x78] sm:$0x3] }
  0x80   :  { %v549_v16 = vadd.f32 %v525_v19, %v477_v21  ;;  %v741_v62 = vmul.f32 0.1259791, %v717_v43  ;;  %1157 = vmatpush.msra.mxu3 %v2838_v30  ;;  %v1213_v26 = vand.u32 4294901760, %v1212_v54  ;;  %v452_v33 = vmul.f32 0.03320773, %v428_v45  ;;  %v4068_v43 = vld [vmem:[#allocation55_spill] sm:$0xff] }
  0x81   :  { %v332_v14 = vadd.f32 %v308_v22, %v260_v60  ;;  %v572_v6 = vadd.f32 %v4064_v10, %v4063_v25  ;;  %1159 = vmatmul.f32.vlgmr.msra.gmra.mxu3 %v2635_v29  ;;  %v2931_v24 = vsub.f32 %v766_v13, %v2924_v8  ;;  %1183 = vmatpush.msrb.mxu0 %v2924_v8  ;;  %v524_v9 = vmul.f32 0.05475029, %v500_v48  ;;  %v2954_v28 = vld [vmem:[%s3730_s1 + $0x98] sm:$0x3] }
  0x82   :  { %v621_v27 = vadd.f32 %v597_v3, %v549_v16  ;;  %v644_v19 = vadd.f32 %v4066_v38, %v4065_v17  ;;  %1281 = vmatpush.msrb.mxu3 %v2884_v23  ;;  %1214 = vmatpush.msrb.mxu1 %v1213_v26  ;;  %v716_v31 = vadd.f32 %v4068_v43, %v4067_v36  ;;  %v123_v4 = vmul.f32 0.133176, %v2942_v20  ;;  %v2961_v52 = vld [vmem:[%s3730_s1 + $0xb8] sm:$0x3] }
  0x83   :  { %v404_v30 = vadd.f32 %v380_v44, %v332_v14  ;;  %v147_v47 = vadd.f32 %v1947_v7, %v2922_v55  ;;  %1255 = vmatpush.msrb.mxu2 %v2931_v24  ;;  %v3837_v46 = vand.u32 4294901760, %v2931_v24  ;;  %v219_v51 = vadd.f32 %v2954_v28, %v4070_v11  ;;  %v2969_v22 = vld [vmem:[%s3730_s1 + $0xd8] sm:$0x3]  ;;  %v3022_v7 = vld [vmem:[%s3730_s1 + $0x2b0] sm:$0xff] }
  0x84   :  { %v693_v59 = vadd.f32 %v669_v5, %v621_v27  ;;  %v291_v45 = vadd.f32 %v2961_v52, %v4071_v56  ;;  %1283 = vmatpush.msrb.mxu3 %v2924_v8  ;;  %v596_v21 = vmul.f32 0.08077533, %v572_v6  ;;  %v2974_v58 = vld [vmem:[%s3730_s1 + $0x258] sm:$0x3]  ;;  %v740_v10 = vmul.f32 0.1259791, %v716_v31 }
  0x85   :  { %v476_v13 = vadd.f32 %v452_v33, %v404_v30  ;;  %v171_v3 = vmul.f32 0.0014794517, %v147_v47  ;;  %4072 = vst [vmem:[#allocation38_spill] sm:$0xff] %v2974_v58  ;;  %v363_v54 = vadd.f32 %v2974_v58, %v2969_v22  ;;  %v1218_v44 = vsub.f32 %v2931_v24, %v3837_v46  ;;  %v2984_v18 = vld [vmem:[%s3730_s1 + $0xf8] sm:$0x3]  ;;  %v1963_v46 = vld [vmem:[%s3730_s1 + $0x70] sm:$0xff] }
  0x86   :  { %v765_v60 = vadd.f32 %v741_v62, %v693_v59  ;;  %v243_v12 = vmul.f32 0.003804239, %v219_v51  ;;  %4073 = vst [vmem:[#allocation43_spill] sm:$0xff] %v2984_v18  ;;  %v2989_v48 = vld [vmem:[%s3730_s1 + $0x238] sm:$0x3] }
  0x87   :  { %4074 = vst [vmem:[#allocation39_spill] sm:$0xff] %v2989_v48  ;;  %v435_v16 = vadd.f32 %v2989_v48, %v2984_v18  ;;  %v548_v5 = vadd.f32 %v524_v9, %v476_v13  ;;  %v668_v62 = vmul.f32 0.106639, %v644_v19  ;;  %v195_v26 = vadd.f32 %v171_v3, %v123_v4  ;;  %v2998_v6 = vld [vmem:[%s3730_s1 + $0x118] sm:$0x3] }
  0x88   :  { %v315_v14 = vmul.f32 0.008753463, %v291_v45  ;;  %v2993_v33 = vand.u32 4294901760, %v765_v60  ;;  %v1219_v25 = vand.u32 4294901760, %v1218_v44  ;;  %4075 = vst [vmem:[#allocation42_spill] sm:$0xff] %v2998_v6 }
  0x89   :  { %v3003_v27 = vld [vmem:[%s3730_s1 + $0x218] sm:$0x3]  ;;  %v620_v17 = vadd.f32 %v596_v21, %v548_v5  ;;  %v267_v38 = vadd.f32 %v243_v12, %v195_v26  ;;  %v387_v19 = vmul.f32 0.01802341, %v363_v54  ;;  %4079 = vst [vmem:[#allocation5_spill] sm:$0xff] %v3022_v7 }
  0x8a   :  { %4076 = vst [vmem:[#allocation41_spill] sm:$0xff] %v3003_v27  ;;  %v507_v9 = vadd.f32 %v3003_v27, %v2998_v6  ;;  %v3010_v30 = vld [vmem:[%s3730_s1 + $0x138] sm:$0x3]  ;;  %v3025_v47 = vsub.f32 %v765_v60, %v2993_v33  ;;  %1185 = vmatpush.msrb.mxu0 %v2993_v33  ;;  %1285 = vmatpush.msrb.mxu3 %v2993_v33  ;;  %v459_v59 = vmul.f32 0.03320773, %v435_v16  ;;  %v3056_v16 = vld [vmem:[%s3730_s1 + $0x190] sm:$0xff] }
  0x8b   :  { %4077 = vst [vmem:[#allocation52_spill] sm:$0xff] %v3010_v30  ;;  %v3015_v31 = vld [vmem:[%s3730_s1 + $0x1f8] sm:$0x3]  ;;  %1220 = vmatpush.msrb.mxu1 %v1219_v25  ;;  %v692_v60 = vadd.f32 %v668_v62, %v620_v17  ;;  %v339_v44 = vadd.f32 %v315_v14, %v267_v38  ;;  %v122_v5 = vmul.f32 0.133176, %v3056_v16  ;;  %v146_v25 = vadd.f32 %v1963_v46, %v3022_v7  ;;  %v3068_v62 = vld [vmem:[%s3730_s1 + $0x90] sm:$0xff] }
  0x8c   :  { %4078 = vst [vmem:[#allocation14_spill] sm:$0xff] %v3015_v31  ;;  %v579_v4 = vadd.f32 %v3015_v31, %v3010_v30  ;;  %v3032_v51 = vld [vmem:[%s3730_s1 + $0x158] sm:$0x3]  ;;  %v531_v12 = vmul.f32 0.05475029, %v507_v9  ;;  %1258 = vmatpush.msrb.mxu2 %v3025_v47  ;;  %v4086_v14 = vld [vmem:[#allocation36_spill] sm:$0xff] }
  0x8d   :  { %4080 = vst [vmem:[#allocation6_spill] sm:$0xff] %v3032_v51  ;;  %v3037_v45 = vld [vmem:[%s3730_s1 + $0x1d8] sm:$0x3]  ;;  %v218_v9 = vadd.f32 %v3068_v62, %v4086_v14  ;;  %v3075_v17 = vld [vmem:[%s3730_s1 + $0xb0] sm:$0xff]  ;;  %v764_v63 = vadd.f32 %v740_v10, %v692_v60  ;;  %v411_v26 = vadd.f32 %v387_v19, %v339_v44  ;;  %v4091_v19 = vand.u32 4294901760, %v3025_v47 }
  0x8e   :  { %4081 = vst [vmem:[#allocation7_spill] sm:$0xff] %v3037_v45  ;;  %v651_v13 = vadd.f32 %v3037_v45, %v3032_v51  ;;  %v3044_v21 = vld [vmem:[%s3730_s1 + $0x178] sm:$0x3]  ;;  %v290_v38 = vadd.f32 %v3075_v17, %v2628_v42  ;;  %v3082_v46 = vld [vmem:[%s3730_s1 + $0xd0] sm:$0xff]  ;;  %v603_v44 = vmul.f32 0.08077533, %v579_v4 }
  0x8f   :  { %4082 = vst [vmem:[#allocation21_spill] sm:$0xff] %v3044_v21  ;;  %v3049_v3 = vld [vmem:[%s3730_s1 + $0x1b8] sm:$0x3]  ;;  %v3094_v7 = vld [vmem:[%s3730_s1 + $0xf0] sm:$0xff]  ;;  %v1224_v60 = vsub.f32 %v3025_v47, %v4091_v19 }
  0x90   :  { %4083 = vst [vmem:[#allocation8_spill] sm:$0xff] %v3049_v3  ;;  %v723_v54 = vadd.f32 %v3049_v3, %v3044_v21  ;;  %v3099_v42 = vld [vmem:[%s3730_s1 + $0x230] sm:$0xff]  ;;  %v675_v45 = vmul.f32 0.106639, %v651_v13  ;;  %v314_v51 = vmul.f32 0.008753463, %v290_v38 }
  0x91   :  { %4084 = vst [vmem:[#allocation20_spill] sm:$0xff] %v3056_v16  ;;  %v3087_v16 = vld [vmem:[%s3730_s1 + $0x250] sm:$0xff]  ;;  %v434_v10 = vadd.f32 %v3099_v42, %v3094_v7  ;;  %v1225_v21 = vand.u32 4294901760, %v1224_v60  ;;  %v1978_v60 = vld [vmem:[%s3730_s1 + $0x68] sm:$0xff] }
  0x92   :  { %4085 = vst [vmem:[#allocation9_spill] sm:$0xff] %v3068_v62  ;;  %v362_v14 = vadd.f32 %v3087_v16, %v3082_v46  ;;  %v483_v62 = vadd.f32 %v459_v59, %v411_v26  ;;  %v747_v20 = vmul.f32 0.1259791, %v723_v54  ;;  %v3111_v27 = vld [vmem:[%s3730_s1 + $0x110] sm:$0xff]  ;;  %v3123_v59 = vld [vmem:[%s3730_s1 + $0x2a8] sm:$0xff] }
  0x93   :  { %4087 = vst [vmem:[#allocation19_spill] sm:$0xff] %v3075_v17  ;;  %v170_v17 = vmul.f32 0.0014794517, %v146_v25  ;;  %v3116_v19 = vld [vmem:[%s3730_s1 + $0x210] sm:$0xff]  ;;  %v458_v26 = vmul.f32 0.03320773, %v434_v10  ;;  %1226 = vmatpush.msrb.mxu1 %v1225_v21 }
  0x94   :  { %4088 = vst [vmem:[#allocation10_spill] sm:$0xff] %v3082_v46  ;;  %v3106_v46 = vand.u32 4294901760, %v764_v63  ;;  %v506_v4 = vadd.f32 %v3116_v19, %v3111_v27  ;;  %v555_v54 = vadd.f32 %v531_v12, %v483_v62  ;;  %v3146_v12 = vld [vmem:[%s3730_s1 + $0x150] sm:$0xff] }
  0x95   :  { %4089 = vst [vmem:[#allocation18_spill] sm:$0xff] %v3087_v16  ;;  %v242_v16 = vmul.f32 0.003804239, %v218_v9  ;;  %v194_v31 = vadd.f32 %v170_v17, %v122_v5  ;;  %v386_v5 = vmul.f32 0.01802341, %v362_v14  ;;  %v3134_v9 = vld [vmem:[%s3730_s1 + $0x130] sm:$0xff] }
  0x96   :  { %4090 = vst [vmem:[#allocation11_spill] sm:$0xff] %v3094_v7  ;;  %v3126_v13 = vsub.f32 %v764_v63, %v3106_v46  ;;  %1187 = vmatpush.msrb.mxu0 %v3106_v46  ;;  %1287 = vmatpush.msrb.mxu3 %v3106_v46  ;;  %v3139_v63 = vld [vmem:[%s3730_s1 + $0x1f0] sm:$0xff]  ;;  %v627_v62 = vadd.f32 %v603_v44, %v555_v54  ;;  %v4098_v54 = vand.u32 4294901760, %v2898_v35 }
  0x97   :  { %4092 = vst [vmem:[#allocation17_spill] sm:$0xff] %v3116_v19  ;;  %1193 = vmatmul.f32.vlgmr.msrb.gmra.mxu0 %v2686_v0  ;;  %v266_v25 = vadd.f32 %v242_v16, %v194_v31  ;;  %v578_v17 = vadd.f32 %v3139_v63, %v3134_v9  ;;  %v3151_v31 = vld [vmem:[%s3730_s1 + $0x1d0] sm:$0xff]  ;;  %v121_v16 = vmul.f32 0.133176, %v3993_v34  ;;  %1291 = vmatmul.f32.vlgmr.msrb.gmra.mxu3 %v2658_v40  ;;  %v530_v0 = vmul.f32 0.05475029, %v506_v4 }
  0x98   :  { %4093 = vst [vmem:[#allocation12_spill] sm:$0xff] %v3123_v59  ;;  %v650_v21 = vadd.f32 %v3151_v31, %v3146_v12  ;;  %1261 = vmatpush.msrb.mxu2 %v3126_v13  ;;  %v1229_v14 = vand.u32 4294901760, %v3126_v13  ;;  %v3162_v38 = vld [vmem:[%s3730_s1 + $0x170] sm:$0xff]  ;;  %v145_v44 = vadd.f32 %v1978_v60, %v3123_v59  ;;  %1310 = vmatpush.msra.mxu0 %v4098_v54  ;;  %v4100_v59 = vand.u32 4294901760, %v2931_v24 }
  0x99   :  { %4094 = vst [vmem:[#allocation16_spill] sm:$0xff] %v3139_v63  ;;  %v3167_v10 = vld [vmem:[%s3730_s1 + $0x1b0] sm:$0xff]  ;;  %1264 = vmatmul.f32.vlgmr.msrb.gmra.mxu2 %v2644_v39  ;;  %v338_v40 = vadd.f32 %v314_v51, %v266_v25  ;;  %v3188_v63 = vld [vmem:[%s3730_s1 + $0xa8] sm:$0xff]  ;;  %v699_v35 = vadd.f32 %v675_v45, %v627_v62 }
  0x9a   :  { %4095 = vst [vmem:[#allocation13_spill] sm:$0xff] %v3151_v31  ;;  %v722_v34 = vadd.f32 %v3167_v10, %v3162_v38  ;;  %v3181_v31 = vld [vmem:[%s3730_s1 + $0x88] sm:$0xff]  ;;  %v289_v60 = vadd.f32 %v3188_v63, %v2679_v2  ;;  %v1230_v51 = vsub.f32 %v3126_v13, %v1229_v14  ;;  %v169_v4 = vmul.f32 0.0014794517, %v145_v44  ;;  %1314 = vmatpush.msra.mxu0 %v4100_v59 }
  0x9b   :  { %4096 = vst [vmem:[#allocation15_spill] sm:$0xff] %v3162_v38  ;;  %v217_v38 = vadd.f32 %v3181_v31, %v2845_v53  ;;  %v3196_v25 = vld [vmem:[%s3730_s1 + $0xc8] sm:$0xff]  ;;  %v410_v39 = vadd.f32 %v386_v5, %v338_v40  ;;  %v602_v53 = vmul.f32 0.08077533, %v578_v17  ;;  %v674_v59 = vmul.f32 0.106639, %v650_v21 }
  0x9c   :  { %4097 = vst [vmem:[#allocation22_spill] sm:$0xff] %v3167_v10  ;;  %v361_v54 = vadd.f32 %v3196_v25, %v2435_v1  ;;  %v3205_v2 = vld [vmem:[%s3730_s1 + $0xe8] sm:$0xff]  ;;  %v771_v1 = vadd.f32 %v747_v20, %v699_v35  ;;  %v1231_v40 = vand.u32 4294901760, %v1230_v51  ;;  %v193_v5 = vadd.f32 %v169_v4, %v121_v16 }
  0x9d   :  { %4099 = vst [vmem:[#allocation23_spill] sm:$0xff] %v3181_v31  ;;  %v241_v31 = vmul.f32 0.003804239, %v217_v38  ;;  %v3210_v45 = vld [vmem:[%s3730_s1 + $0x228] sm:$0xff]  ;;  %v313_v17 = vmul.f32 0.008753463, %v289_v60  ;;  %v482_v24 = vadd.f32 %v458_v26, %v410_v39 }
  0x9e   :  { %4101 = vst [vmem:[#allocation24_spill] sm:$0xff] %v3210_v45  ;;  %v433_v13 = vadd.f32 %v3210_v45, %v3205_v2  ;;  %v746_v62 = vmul.f32 0.1259791, %v722_v34  ;;  %v3217_v38 = vld [vmem:[%s3730_s1 + $0x108] sm:$0xff]  ;;  %v4102_v20 = vand.u32 4294901760, %v3025_v47  ;;  %v1356_v39 = vsel %vm785_vm0, %v771_v1, 0  ;;  %1232 = vmatpush.msrb.mxu1 %v1231_v40 }
  0x9f   :  { %v3222_v44 = vld [vmem:[%s3730_s1 + $0x208] sm:$0xff]  ;;  %v265_v26 = vadd.f32 %v241_v31, %v193_v5  ;;  %v385_v21 = vmul.f32 0.01802341, %v361_v54  ;;  %v3232_v34 = vld [vmem:[%s3730_s1 + $0x2a0] sm:$0xff]  ;;  %v3234_v60 = vand.u32 4294901760, %v1356_v39  ;;  %v554_v35 = vadd.f32 %v530_v0, %v482_v24  ;;  %1234 = vmatmul.f32.vlgmr.msrb.gmra.mxu1 %v2635_v29 }
  0xa0   :  { %v505_v45 = vadd.f32 %v3222_v44, %v3217_v38  ;;  %1318 = vmatpush.msra.mxu0 %v4102_v20  ;;  %v457_v16 = vmul.f32 0.03320773, %v433_v13  ;;  %4103 = vst [vmem:[#allocation31_spill] sm:$0xff] %v3232_v34  ;;  %v3240_v47 = vld [vmem:[%s3730_s1 + $0x128] sm:$0xff]  ;;  %1341 = vmatpush.msra.mxu1 %v2884_v23  ;;  %v120_v20 = vmul.f32 0.133176, %v4068_v43  ;;  %v288_v43 = vadd.f32 %v4052_v41, %v4055_v61 }
  0xa1   :  { %v3245_v31 = vld [vmem:[%s3730_s1 + $0x1e8] sm:$0xff]  ;;  %v337_v13 = vadd.f32 %v313_v17, %v265_v26  ;;  %1371 = vmatpush.msra.mxu2 %v3234_v60  ;;  %v3278_v23 = vsub.f32 %v1356_v39, %v3234_v60  ;;  %v216_v17 = vadd.f32 %v2877_v37, %v4053_v49 }
  0xa2   :  { %4104 = vst [vmem:[#allocation25_spill] sm:$0xff] %v3245_v31  ;;  %v577_v51 = vadd.f32 %v3245_v31, %v3240_v47  ;;  %v3252_v4 = vld [vmem:[%s3730_s1 + $0x148] sm:$0xff]  ;;  %1322 = vmatpush.msra.mxu0 %v1229_v14  ;;  %v529_v1 = vmul.f32 0.05475029, %v505_v45  ;;  %v626_v14 = vadd.f32 %v602_v53, %v554_v35  ;;  %v144_v45 = vadd.f32 %v3232_v34, %v4051_v15  ;;  %v3297_v15 = vld [vmem:[%s3730_s1 + $0xe0] sm:$0xff] }
  0xa3   :  { %v3257_v0 = vld [vmem:[%s3730_s1 + $0x1c8] sm:$0xff]  ;;  %1324 = vmatmul.f32.vlgmr.msra.gmra.mxu0 %v2635_v29  ;;  %v409_v26 = vadd.f32 %v385_v21, %v337_v13  ;;  %1343 = vmatpush.msra.mxu1 %v2924_v8  ;;  %v432_v49 = vadd.f32 %v3297_v15, %v4056_v50  ;;  %v3887_v8 = vand.u32 4294901760, %v3278_v23  ;;  %v240_v61 = vmul.f32 0.003804239, %v216_v17  ;;  %v3310_v50 = vld [vmem:[%s3730_s1 + $0x100] sm:$0xff] }
  0xa4   :  { %4105 = vst [vmem:[#allocation30_spill] sm:$0xff] %v3257_v0  ;;  %v649_v54 = vadd.f32 %v3257_v0, %v3252_v4  ;;  %v3265_v40 = vld [vmem:[%s3730_s1 + $0x168] sm:$0xff]  ;;  %v3290_v0 = vld [vmem:[%s3730_s1 + $0xc0] sm:$0xff]  ;;  %v698_v39 = vadd.f32 %v674_v59, %v626_v14  ;;  %v168_v41 = vmul.f32 0.0014794517, %v144_v45  ;;  %1442 = vmatpush.msrb.mxu0 %v3278_v23  ;;  %v504_v59 = vadd.f32 %v3310_v50, %v4059_v57 }
  0xa5   :  { %v3270_v5 = vld [vmem:[%s3730_s1 + $0x1a8] sm:$0xff]  ;;  %4107 = vst [vmem:[#allocation29_spill] sm:$0xff] %v3290_v0  ;;  %v360_v53 = vadd.f32 %v3290_v0, %v4054_v32  ;;  %v481_v21 = vadd.f32 %v457_v16, %v409_v26  ;;  %v601_v35 = vmul.f32 0.08077533, %v577_v51  ;;  %v312_v37 = vmul.f32 0.008753463, %v288_v43  ;;  %1345 = vmatpush.msra.mxu1 %v2993_v33 }
  0xa6   :  { %4106 = vst [vmem:[#allocation26_spill] sm:$0xff] %v3270_v5  ;;  %v721_v24 = vadd.f32 %v3270_v5, %v3265_v40  ;;  %v673_v13 = vmul.f32 0.106639, %v649_v54  ;;  %v1402_v32 = vsub.f32 %v3278_v23, %v3887_v8  ;;  %v770_v0 = vadd.f32 %v746_v62, %v698_v39  ;;  %v3317_v16 = vld [vmem:[%s3730_s1 + $0x2d8] sm:$0x3]  ;;  %v3325_v17 = vld [vmem:[%s3730_s1 + $0x120] sm:$0xff] }
  0xa7   :  { %v192_v34 = vadd.f32 %v168_v41, %v120_v20  ;;  %v553_v33 = vadd.f32 %v529_v1, %v481_v21  ;;  %v384_v54 = vmul.f32 0.01802341, %v360_v53  ;;  %v456_v14 = vmul.f32 0.03320773, %v432_v49  ;;  %1347 = vmatpush.msra.mxu1 %v3106_v46  ;;  %4108 = vst [vmem:[#allocation28_spill] sm:$0xff] %v3325_v17  ;;  %v3330_v57 = vld [vmem:[%s3730_s1 + $0x1e0] sm:$0xff] }
  0xa8   :  { %v745_v51 = vmul.f32 0.1259791, %v721_v24  ;;  %v1403_v62 = vand.u32 4294901760, %v1402_v32  ;;  %v3320_v20 = vand.u32 4294901760, %v770_v0  ;;  %4109 = vst [vmem:[#allocation27_spill] sm:$0xff] %v3330_v57  ;;  %v576_v1 = vadd.f32 %v3330_v57, %v3325_v17  ;;  %1349 = vmatmul.f32.vlgmr.msra.gmra.mxu1 %v2635_v29  ;;  %v3345_v43 = vld [vmem:[%s3730_s1 + $0x160] sm:$0xff] }
  0xa9   :  { %v264_v45 = vadd.f32 %v240_v61, %v192_v34  ;;  %v625_v46 = vadd.f32 %v601_v35, %v553_v33  ;;  %v528_v24 = vmul.f32 0.05475029, %v504_v59  ;;  %v3338_v34 = vld [vmem:[%s3730_s1 + $0x1c0] sm:$0xff]  ;;  %4110 = vst [vmem:[#allocation47_spill] sm:$0xff] %v3345_v43  ;;  %1471 = vmatpush.msrb.mxu1 %v3234_v60  ;;  %v127_v41 = vmul.f32 0.133176, %v3049_v3 }
  0xaa   :  { %v648_v26 = vadd.f32 %v3338_v34, %v4067_v36  ;;  %v3350_v53 = vld [vmem:[%s3730_s1 + $0x1a0] sm:$0xff]  ;;  %1404 = vmatpush.msra.mxu3 %v1403_v62  ;;  %1373 = vmatpush.msra.mxu2 %v3320_v20  ;;  %v3357_v36 = vsub.f32 %v770_v0, %v3320_v20  ;;  %v151_v61 = vadd.f32 %v2954_v28, %v3317_v16  ;;  %v600_v33 = vmul.f32 0.08077533, %v576_v1 }
  0xab   :  { %4111 = vst [vmem:[#allocation46_spill] sm:$0xff] %v3350_v53  ;;  %v720_v49 = vadd.f32 %v3350_v53, %v3345_v43  ;;  %v336_v39 = vadd.f32 %v312_v37, %v264_v45  ;;  %v697_v21 = vadd.f32 %v673_v13, %v625_v46  ;;  %1473 = vmatpush.msrb.mxu1 %v3320_v20 }
  0xac   :  { %v223_v35 = vadd.f32 %v2961_v52, %v2922_v55  ;;  %v295_v32 = vadd.f32 %v2969_v22, %v4070_v11  ;;  %v367_v59 = vadd.f32 %v2984_v18, %v4071_v56  ;;  %v3891_v0 = vand.u32 4294901760, %v3357_v36  ;;  %1445 = vmatpush.msrb.mxu0 %v3357_v36 }
  0xad   :  { %v408_v37 = vadd.f32 %v384_v54, %v336_v39  ;;  %v175_v62 = vmul.f32 0.0014794517, %v151_v61  ;;  %v769_v28 = vadd.f32 %v745_v51, %v697_v21  ;;  %v672_v13 = vmul.f32 0.106639, %v648_v26  ;;  %v4112_v21 = vld [vmem:[#allocation41_spill] sm:$0xff] }
  0xae   :  { %v247_v45 = vmul.f32 0.003804239, %v223_v35  ;;  %v439_v46 = vadd.f32 %v2998_v6, %v2974_v58  ;;  %v1408_v11 = vsub.f32 %v3357_v36, %v3891_v0  ;;  %v319_v56 = vmul.f32 0.008753463, %v295_v32  ;;  %v4113_v35 = vld [vmem:[#allocation6_spill] sm:$0xff]  ;;  %v3385_v0 = vld [vmem:[%s3730_s1 + $0x2d0] sm:$0xff] }
  0xaf   :  { %v480_v8 = vadd.f32 %v456_v14, %v408_v37  ;;  %v199_v3 = vadd.f32 %v175_v62, %v127_v41  ;;  %v3376_v18 = vand.u32 4294901760, %v769_v28  ;;  %v744_v54 = vmul.f32 0.1259791, %v720_v49  ;;  %4114 = vst [vmem:[#allocation40_spill] sm:$0xff] %v3385_v0  ;;  %v4115_v41 = vld [vmem:[#allocation14_spill] sm:$0xff]  ;;  %v4116_v32 = vld [vmem:[#allocation21_spill] sm:$0xff] }
  0xb0   :  { %v391_v1 = vmul.f32 0.01802341, %v367_v59  ;;  %v511_v39 = vadd.f32 %v3010_v30, %v2989_v48  ;;  %v1409_v51 = vand.u32 4294901760, %v1408_v11  ;;  %v583_v58 = vadd.f32 %v4113_v35, %v4112_v21  ;;  %v4121_v35 = vld [vmem:[#allocation19_spill] sm:$0xff] }
  0xb1   :  { %v552_v26 = vadd.f32 %v528_v24, %v480_v8  ;;  %v271_v61 = vadd.f32 %v247_v45, %v199_v3  ;;  %1375 = vmatpush.msra.mxu2 %v3376_v18  ;;  %v3389_v14 = vsub.f32 %v769_v28, %v3376_v18  ;;  %1475 = vmatpush.msrb.mxu1 %v3376_v18  ;;  %v463_v49 = vmul.f32 0.03320773, %v439_v46  ;;  %v4117_v3 = vld [vmem:[#allocation44_spill] sm:$0xff]  ;;  %v4118_v24 = vld [vmem:[#allocation7_spill] sm:$0xff]  ;;  %v4119_v28 = vld [vmem:[#allocation9_spill] sm:$0xff] }
  0xb2   :  { %v655_v8 = vadd.f32 %v4116_v32, %v4115_v41  ;;  %v727_v59 = vadd.f32 %v4118_v24, %v4117_v3  ;;  %1410 = vmatpush.msra.mxu3 %v1409_v51  ;;  %v535_v45 = vmul.f32 0.05475029, %v511_v39  ;;  %v126_v11 = vmul.f32 0.133176, %v3167_v10  ;;  %v4120_v46 = vld [vmem:[#allocation5_spill] sm:$0xff]  ;;  %v4122_v41 = vld [vmem:[#allocation36_spill] sm:$0xff] }
  0xb3   :  { %v624_v37 = vadd.f32 %v600_v33, %v552_v26  ;;  %v343_v62 = vadd.f32 %v319_v56, %v271_v61  ;;  %v3898_v21 = vand.u32 4294901760, %v3389_v14  ;;  %1448 = vmatpush.msrb.mxu0 %v3389_v14  ;;  %v150_v48 = vadd.f32 %v4119_v28, %v3385_v0  ;;  %v4123_v32 = vld [vmem:[#allocation10_spill] sm:$0xff]  ;;  %v3408_v56 = vld [vmem:[%s3730_s1 + $0x270] sm:$0xff]  ;;  %v4127_v0 = vld [vmem:[#allocation15_spill] sm:$0xff] }
  0xb4   :  { %v222_v30 = vadd.f32 %v4121_v35, %v4120_v46  ;;  %v294_v6 = vadd.f32 %v4123_v32, %v4122_v41  ;;  %v607_v33 = vmul.f32 0.08077533, %v583_v58  ;;  %4124 = vst [vmem:[#allocation54_spill] sm:$0xff] %v3408_v56  ;;  %v366_v39 = vadd.f32 %v3408_v56, %v3094_v7  ;;  %v4125_v10 = vld [vmem:[#allocation18_spill] sm:$0xff] }
  0xb5   :  { %v696_v3 = vadd.f32 %v672_v13, %v624_v37  ;;  %v415_v51 = vadd.f32 %v391_v1, %v343_v62  ;;  %v1414_v26 = vsub.f32 %v3389_v14, %v3898_v21  ;;  %v174_v61 = vmul.f32 0.0014794517, %v150_v48 }
  0xb6   :  { %v246_v28 = vmul.f32 0.003804239, %v222_v30  ;;  %v438_v41 = vadd.f32 %v3111_v27, %v4125_v10  ;;  %v679_v58 = vmul.f32 0.106639, %v655_v8  ;;  %v318_v37 = vmul.f32 0.008753463, %v294_v6 }
  0xb7   :  { %v768_v13 = vadd.f32 %v744_v54, %v696_v3  ;;  %v487_v1 = vadd.f32 %v463_v49, %v415_v51  ;;  %v1415_v62 = vand.u32 4294901760, %v1414_v26  ;;  %v198_v46 = vadd.f32 %v174_v61, %v126_v11  ;;  %v4126_v30 = vld [vmem:[#allocation16_spill] sm:$0xff]  ;;  %v4129_v11 = vld [vmem:[#allocation13_spill] sm:$0xff] }
  0xb8   :  { %v510_v32 = vadd.f32 %v3134_v9, %v3099_v42  ;;  %v582_v56 = vadd.f32 %v3146_v12, %v3116_v19  ;;  %v751_v48 = vmul.f32 0.1259791, %v727_v59  ;;  %v654_v35 = vadd.f32 %v4127_v0, %v4126_v30  ;;  %v3428_v54 = vld [vmem:[%s3730_s1 + $0x2c8] sm:$0xff]  ;;  %v4131_v19 = vld [vmem:[#allocation67_spill] sm:$0xff] }
  0xb9   :  { %v3421_v7 = vand.u32 4294901760, %v768_v13  ;;  %v559_v21 = vadd.f32 %v535_v45, %v487_v1  ;;  %1416 = vmatpush.msra.mxu3 %v1415_v62  ;;  %v270_v6 = vadd.f32 %v246_v28, %v198_v46  ;;  %v390_v49 = vmul.f32 0.01802341, %v366_v39  ;;  %v4128_v3 = vld [vmem:[#allocation20_spill] sm:$0xff]  ;;  %v4132_v39 = vld [vmem:[#allocation23_spill] sm:$0xff] }
  0xba   :  { %v462_v8 = vmul.f32 0.03320773, %v438_v41  ;;  %v726_v51 = vadd.f32 %v4129_v11, %v4128_v3  ;;  %v534_v26 = vmul.f32 0.05475029, %v510_v32  ;;  %v606_v61 = vmul.f32 0.08077533, %v582_v56 }
  0xbb   :  { %1377 = vmatpush.msra.mxu2 %v3421_v7  ;;  %v1418_v45 = vsub.f32 %v768_v13, %v3421_v7  ;;  %v631_v59 = vadd.f32 %v607_v33, %v559_v21  ;;  %1477 = vmatpush.msrb.mxu1 %v3421_v7  ;;  %v4130_v1 = vld [vmem:[#allocation68_spill] sm:$0xff]  ;;  %v342_v30 = vadd.f32 %v318_v37, %v270_v6  ;;  %v125_v46 = vmul.f32 0.133176, %v3270_v5  ;;  %v4135_v56 = vld [vmem:[#allocation45_spill] sm:$0xff]  ;;  %v4136_v37 = vld [vmem:[#allocation66_spill] sm:$0xff] }
  0xbc   :  { %1383 = vmatmul.f32.vlgmr.msra.gmra.mxu2 %v4130_v1  ;;  %1481 = vmatmul.f32.vlgmr.msrb.gmra.mxu1 %v4131_v19  ;;  %v149_v28 = vadd.f32 %v4132_v39, %v3428_v54  ;;  %v4133_v41 = vld [vmem:[#allocation12_spill] sm:$0xff]  ;;  %v4134_v21 = vand.u32 4294901760, %v3278_v23  ;;  %v678_v33 = vmul.f32 0.106639, %v654_v35  ;;  %v293_v13 = vadd.f32 %v3196_v25, %v4135_v56 }
  0xbd   :  { %v221_v62 = vadd.f32 %v3188_v63, %v4133_v41  ;;  %v1419_v3 = vand.u32 4294901760, %v1418_v45  ;;  %1451 = vmatpush.msrb.mxu0 %v1418_v45  ;;  %v703_v32 = vadd.f32 %v679_v58, %v631_v59  ;;  %v414_v6 = vadd.f32 %v390_v49, %v342_v30  ;;  %v3450_v39 = vld [vmem:[%s3730_s1 + $0x268] sm:$0xff] }
  0xbe   :  { %1500 = vmatpush.msrb.mxu2 %v4134_v21  ;;  %1454 = vmatmul.f32.vlgmr.msrb.gmra.mxu0 %v4136_v37  ;;  %v173_v5 = vmul.f32 0.0014794517, %v149_v28  ;;  %4137 = vst [vmem:[#allocation49_spill] sm:$0xff] %v3450_v39  ;;  %v365_v23 = vadd.f32 %v3450_v39, %v3205_v2  ;;  %v4138_v58 = vand.u32 4294901760, %v3357_v36  ;;  %v750_v59 = vmul.f32 0.1259791, %v726_v51 }
  0xbf   :  { %v245_v19 = vmul.f32 0.003804239, %v221_v62  ;;  %v1420_v21 = vsub.f32 %v1418_v45, %v1419_v3  ;;  %v775_v35 = vadd.f32 %v751_v48, %v703_v32  ;;  %v3459_v30 = vld [vmem:[%s3730_s1 + $0x248] sm:$0xff]  ;;  %v486_v28 = vadd.f32 %v462_v8, %v414_v6  ;;  %v3468_v36 = vld [vmem:[%s3730_s1 + $0x2c0] sm:$0xff] }
  0xc0   :  { %1504 = vmatpush.msrb.mxu2 %v4138_v58  ;;  %v437_v49 = vadd.f32 %v3459_v30, %v3217_v38  ;;  %v197_v62 = vadd.f32 %v173_v5, %v125_v46  ;;  %v317_v56 = vmul.f32 0.008753463, %v293_v13  ;;  %v4139_v41 = vld [vmem:[#allocation24_spill] sm:$0xff]  ;;  %v4140_v51 = vand.u32 4294901760, %v3389_v14 }
  0xc1   :  { %v509_v39 = vadd.f32 %v3240_v47, %v4139_v41  ;;  %v1421_v48 = vand.u32 4294901760, %v1420_v21  ;;  %v1546_v45 = vsel %vm785_vm0, %v775_v35, 0  ;;  %v581_v32 = vadd.f32 %v3252_v4, %v3222_v44  ;;  %v2003_v35 = vld [vmem:[%s3730_s1 + $0x80] sm:$0xff] }
  0xc2   :  { %1508 = vmatpush.msrb.mxu2 %v4140_v51  ;;  %v653_v5 = vadd.f32 %v3265_v40, %v3245_v31  ;;  %v3477_v8 = vand.u32 4294901760, %v1546_v45  ;;  %v558_v46 = vadd.f32 %v534_v26, %v486_v28  ;;  %v269_v13 = vadd.f32 %v245_v19, %v197_v62  ;;  %v3494_v28 = vld [vmem:[%s3730_s1 + $0xa0] sm:$0xff] }
  0xc3   :  { %v389_v6 = vmul.f32 0.01802341, %v365_v23  ;;  %1422 = vmatpush.msra.mxu3 %v1421_v48  ;;  %v461_v58 = vmul.f32 0.03320773, %v437_v49  ;;  %v533_v21 = vmul.f32 0.05475029, %v509_v39  ;;  %v148_v51 = vadd.f32 %v2003_v35, %v3468_v36 }
  0xc4   :  { %1512 = vmatpush.msrb.mxu2 %v1419_v3  ;;  %v124_v14 = vmul.f32 0.133176, %v3350_v53  ;;  %1424 = vmatmul.f32.vlgmr.msra.gmra.mxu3 %v2635_v29  ;;  %v3487_v26 = vsub.f32 %v1546_v45, %v3477_v8  ;;  %v630_v19 = vadd.f32 %v606_v61, %v558_v46  ;;  %v341_v23 = vadd.f32 %v317_v56, %v269_v13  ;;  %v4141_v62 = vld [vmem:[#allocation31_spill] sm:$0xff]  ;;  %v4142_v35 = vld [vmem:[#allocation37_spill] sm:$0xff] }
  0xc5   :  { %1514 = vmatmul.f32.vlgmr.msrb.gmra.mxu2 %v2635_v29  ;;  %v605_v3 = vmul.f32 0.08077533, %v581_v32  ;;  %1531 = vmatpush.msrb.mxu3 %v3234_v60  ;;  %v677_v39 = vmul.f32 0.106639, %v653_v5  ;;  %v172_v49 = vmul.f32 0.0014794517, %v148_v51  ;;  %v220_v48 = vadd.f32 %v3494_v28, %v4141_v62 }
  0xc6   :  { %1561 = vmatpush.msra.mxu0 %v3477_v8  ;;  %v4143_v45 = vld [vmem:[#allocation29_spill] sm:$0xff]  ;;  %1632 = vmatpush.msra.mxu2 %v3487_v26  ;;  %v702_v61 = vadd.f32 %v678_v33, %v630_v19  ;;  %v3904_v60 = vand.u32 4294901760, %v3487_v26  ;;  %v413_v56 = vadd.f32 %v389_v6, %v341_v23  ;;  %v3505_v32 = vld [vmem:[%s3730_s1 + $0x260] sm:$0xff] }
  0xc7   :  { %v292_v53 = vadd.f32 %v4143_v45, %v4142_v35  ;;  %4144 = vst [vmem:[#allocation32_spill] sm:$0xff] %v3505_v32  ;;  %v364_v5 = vadd.f32 %v3505_v32, %v3297_v15  ;;  %1533 = vmatpush.msrb.mxu3 %v3320_v20  ;;  %v196_v46 = vadd.f32 %v172_v49, %v124_v14  ;;  %v244_v13 = vmul.f32 0.003804239, %v220_v48  ;;  %v3513_v33 = vld [vmem:[%s3730_s1 + $0x240] sm:$0xff]  ;;  %v3523_v20 = vld [vmem:[%s3730_s1 + $0x188] sm:$0xff] }
  0xc8   :  { %4145 = vst [vmem:[#allocation53_spill] sm:$0xff] %v3513_v33  ;;  %v436_v6 = vadd.f32 %v3513_v33, %v3310_v50  ;;  %v774_v19 = vadd.f32 %v750_v59, %v702_v61  ;;  %v1592_v23 = vsub.f32 %v3487_v26, %v3904_v60  ;;  %v485_v35 = vadd.f32 %v461_v58, %v413_v56  ;;  %v3531_v59 = vld [vmem:[%s3730_s1 + $0x220] sm:$0xff]  ;;  %v107_v61 = vld [vmem:[%s3730_s1 + $0x2f8] sm:$0x3] }
  0xc9   :  { %v316_v51 = vmul.f32 0.008753463, %v292_v53  ;;  %v4146_v53 = vld [vmem:[#allocation30_spill] sm:$0xff]  ;;  %1535 = vmatpush.msrb.mxu3 %v3376_v18  ;;  %v268_v49 = vadd.f32 %v244_v13, %v196_v46  ;;  %v388_v48 = vmul.f32 0.01802341, %v364_v5  ;;  %4147 = vst [vmem:[#allocation61_spill] sm:$0xff] %v3531_v59  ;;  %v508_v58 = vadd.f32 %v3531_v59, %v3325_v17 }
  0xca   :  { %v725_v14 = vadd.f32 %v3523_v20, %v4146_v53  ;;  %v131_v56 = vmul.f32 0.133176, %v4118_v24  ;;  %v3539_v60 = vand.u32 4294901760, %v774_v19  ;;  %v1593_v33 = vand.u32 4294901760, %v1592_v23  ;;  %v3545_v13 = vld [vmem:[%s3730_s1 + $0x200] sm:$0xff] }
  0xcb   :  { %v557_v18 = vadd.f32 %v533_v21, %v485_v35  ;;  %v460_v46 = vmul.f32 0.03320773, %v436_v6  ;;  %1537 = vmatpush.msrb.mxu3 %v3421_v7  ;;  %v340_v5 = vadd.f32 %v316_v51, %v268_v49  ;;  %4148 = vst [vmem:[#allocation62_spill] sm:$0xff] %v3545_v13  ;;  %v3550_v59 = vld [vmem:[%s3730_s1 + $0x140] sm:$0xff]  ;;  %v652_v21 = vadd.f32 %v3345_v43, %v3330_v57 }
  0xcc   :  { %4149 = vst [vmem:[#allocation60_spill] sm:$0xff] %v3550_v59  ;;  %v580_v24 = vadd.f32 %v3550_v59, %v3545_v13  ;;  %v3559_v7 = vld [vmem:[%s3730_s1 + $0x180] sm:$0xff]  ;;  %1539 = vmatmul.f32.vlgmr.msrb.gmra.mxu3 %v2635_v29  ;;  %v3565_v6 = vsub.f32 %v774_v19, %v3539_v60  ;;  %1563 = vmatpush.msra.mxu0 %v3539_v60  ;;  %v749_v35 = vmul.f32 0.1259791, %v725_v14  ;;  %v532_v13 = vmul.f32 0.05475029, %v508_v58 }
  0xcd   :  { %4150 = vst [vmem:[#allocation33_spill] sm:$0xff] %v3559_v7  ;;  %v724_v51 = vadd.f32 %v3559_v7, %v3338_v34  ;;  %v629_v23 = vadd.f32 %v605_v3, %v557_v18  ;;  %v155_v49 = vadd.f32 %v2961_v52, %v107_v61  ;;  %1661 = vmatpush.msra.mxu3 %v3477_v8  ;;  %v4151_v7 = vld [vmem:[#allocation43_spill] sm:$0xff]  ;;  %v2012_v52 = vld [vmem:[%s3730_s1 + $0x298] sm:$0x3] }
  0xce   :  { %1594 = vmatpush.msra.mxu1 %v1593_v33  ;;  %v412_v57 = vadd.f32 %v388_v48, %v340_v5  ;;  %v227_v43 = vadd.f32 %v2969_v22, %v3317_v16  ;;  %v299_v59 = vadd.f32 %v4151_v7, %v2922_v55  ;;  %1635 = vmatpush.msra.mxu2 %v3565_v6  ;;  %v1597_v31 = vand.u32 4294901760, %v3565_v6  ;;  %v4152_v14 = vld [vmem:[#allocation42_spill] sm:$0xff]  ;;  %v4153_v16 = vld [vmem:[#allocation52_spill] sm:$0xff] }
  0xcf   :  { %v701_v19 = vadd.f32 %v677_v39, %v629_v23  ;;  %v179_v3 = vmul.f32 0.0014794517, %v155_v49  ;;  %v371_v33 = vadd.f32 %v2012_v52, %v4152_v14  ;;  %1663 = vmatpush.msra.mxu3 %v3539_v60  ;;  %v604_v58 = vmul.f32 0.08077533, %v580_v24  ;;  %v2013_v55 = vld [vmem:[%s3730_s1 + $0x278] sm:$0x3] }
  0xd0   :  { %v484_v48 = vadd.f32 %v460_v46, %v412_v57  ;;  %v251_v22 = vmul.f32 0.003804239, %v227_v43  ;;  %v443_v39 = vadd.f32 %v2013_v55, %v4153_v16  ;;  %v1598_v18 = vsub.f32 %v3565_v6, %v1597_v31  ;;  %v4154_v14 = vld [vmem:[#allocation38_spill] sm:$0xff]  ;;  %v4156_v16 = vld [vmem:[#allocation39_spill] sm:$0xff] }
  0xd1   :  { %v773_v61 = vadd.f32 %v749_v35, %v701_v19  ;;  %v203_v5 = vadd.f32 %v179_v3, %v131_v56  ;;  %v323_v7 = vmul.f32 0.008753463, %v299_v59  ;;  %v676_v49 = vmul.f32 0.106639, %v652_v21  ;;  %v4155_v57 = vld [vmem:[#allocation6_spill] sm:$0xff]  ;;  %v106_v35 = vld [vmem:[%s3730_s1 + $0x2f0] sm:$0xff] }
  0xd2   :  { %v556_v23 = vadd.f32 %v532_v13, %v484_v48  ;;  %v748_v52 = vmul.f32 0.1259791, %v724_v51  ;;  %v515_v46 = vadd.f32 %v4155_v57, %v4154_v14  ;;  %v1599_v24 = vand.u32 4294901760, %v1598_v18  ;;  %v4157_v56 = vld [vmem:[#allocation21_spill] sm:$0xff]  ;;  %v4158_v13 = vld [vmem:[#allocation44_spill] sm:$0xff] }
  0xd3   :  { %v3590_v43 = vand.u32 4294901760, %v773_v61  ;;  %v275_v32 = vadd.f32 %v251_v22, %v203_v5  ;;  %v395_v17 = vmul.f32 0.01802341, %v371_v33  ;;  %v467_v55 = vmul.f32 0.03320773, %v443_v39  ;;  %v4159_v21 = vld [vmem:[#allocation41_spill] sm:$0xff] }
  0xd4   :  { %v628_v19 = vadd.f32 %v604_v58, %v556_v23  ;;  %v587_v59 = vadd.f32 %v4157_v56, %v4156_v16  ;;  %v659_v51 = vadd.f32 %v4159_v21, %v4158_v13  ;;  %v539_v48 = vmul.f32 0.05475029, %v515_v46  ;;  %v4160_v22 = vld [vmem:[#allocation14_spill] sm:$0xff]  ;;  %v4161_v18 = vld [vmem:[#allocation8_spill] sm:$0xff]  ;;  %1600 = vmatpush.msra.mxu1 %v1599_v24  ;;  %v4162_v23 = vld [vmem:[#allocation19_spill] sm:$0xff] }
  0xd5   :  { %v3600_v3 = vsub.f32 %v773_v61, %v3590_v43  ;;  %1565 = vmatpush.msra.mxu0 %v3590_v43  ;;  %1665 = vmatpush.msra.mxu3 %v3590_v43  ;;  %v347_v33 = vadd.f32 %v323_v7, %v275_v32  ;;  %v731_v5 = vadd.f32 %v4161_v18, %v4160_v22  ;;  %v130_v39 = vmul.f32 0.133176, %v4129_v11  ;;  %v4163_v57 = vld [vmem:[#allocation40_spill] sm:$0xff]  ;;  %v4164_v16 = vld [vmem:[#allocation10_spill] sm:$0xff]  ;;  %v4165_v21 = vld [vmem:[#allocation5_spill] sm:$0xff] }
  0xd6   :  { %v700_v58 = vadd.f32 %v676_v49, %v628_v19  ;;  %v154_v14 = vadd.f32 %v4162_v23, %v106_v35  ;;  %v226_v56 = vadd.f32 %v4164_v16, %v4163_v57  ;;  %v4166_v32 = vld [vmem:[#allocation11_spill] sm:$0xff]  ;;  %v2014_v46 = vld [vmem:[%s3730_s1 + $0x290] sm:$0xff]  ;;  %v4167_v19 = vld [vmem:[#allocation54_spill] sm:$0xff]  ;;  %v683_v23 = vmul.f32 0.106639, %v659_v51 }
  0xd7   :  { %1638 = vmatpush.msra.mxu2 %v3600_v3  ;;  %v1603_v61 = vand.u32 4294901760, %v3600_v3  ;;  %v419_v13 = vadd.f32 %v395_v17, %v347_v33  ;;  %v298_v7 = vadd.f32 %v4166_v32, %v4165_v21  ;;  %v370_v49 = vadd.f32 %v2014_v46, %v3111_v27 }
  0xd8   :  { %v772_v11 = vadd.f32 %v748_v52, %v700_v58  ;;  %v178_v24 = vmul.f32 0.0014794517, %v154_v14  ;;  %v250_v35 = vmul.f32 0.003804239, %v226_v56  ;;  %v442_v22 = vadd.f32 %v4167_v19, %v3134_v9  ;;  %v105_v56 = vld [vmem:[%s3730_s1 + $0x2e8] sm:$0xff] }
  0xd9   :  { %v1604_v18 = vsub.f32 %v3600_v3, %v1603_v61  ;;  %v491_v17 = vadd.f32 %v467_v55, %v419_v13  ;;  %v611_v33 = vmul.f32 0.08077533, %v587_v59  ;;  %v322_v21 = vmul.f32 0.008753463, %v298_v7  ;;  %v4171_v13 = vld [vmem:[#allocation22_spill] sm:$0xff]  ;;  %v4172_v7 = vld [vmem:[#allocation67_spill] sm:$0xff] }
  0xda   :  { %v3623_v57 = vand.u32 4294901760, %v772_v11  ;;  %v202_v16 = vadd.f32 %v178_v24, %v130_v39  ;;  %v514_v27 = vadd.f32 %v3146_v12, %v4125_v10  ;;  %v755_v14 = vmul.f32 0.1259791, %v731_v5  ;;  %v4170_v5 = vld [vmem:[#allocation16_spill] sm:$0xff] }
  0xdb   :  { %v1605_v52 = vand.u32 4294901760, %v1604_v18  ;;  %v563_v58 = vadd.f32 %v539_v48, %v491_v17  ;;  %v586_v9 = vadd.f32 %v4127_v0, %v3099_v42  ;;  %v394_v51 = vmul.f32 0.01802341, %v370_v49  ;;  %v4168_v48 = vld [vmem:[#allocation20_spill] sm:$0xff]  ;;  %v4169_v42 = vld [vmem:[#allocation17_spill] sm:$0xff] }
  0xdc   :  { %v1608_v55 = vsub.f32 %v772_v11, %v3623_v57  ;;  %1567 = vmatpush.msra.mxu0 %v3623_v57  ;;  %1667 = vmatpush.msra.mxu3 %v3623_v57  ;;  %v274_v59 = vadd.f32 %v250_v35, %v202_v16  ;;  %v466_v39 = vmul.f32 0.03320773, %v442_v22  ;;  %v538_v10 = vmul.f32 0.05475029, %v514_v27  ;;  %v4174_v17 = vld [vmem:[#allocation12_spill] sm:$0xff] }
  0xdd   :  { %1573 = vmatmul.f32.vlgmr.msra.gmra.mxu0 %v4130_v1  ;;  %1606 = vmatpush.msra.mxu1 %v1605_v52  ;;  %v635_v12 = vadd.f32 %v611_v33, %v563_v58  ;;  %v658_v0 = vadd.f32 %v4169_v42, %v4168_v48  ;;  %v730_v32 = vadd.f32 %v4171_v13, %v4170_v5  ;;  %v129_v24 = vmul.f32 0.133176, %v4146_v53 }
  0xde   :  { %1641 = vmatpush.msra.mxu2 %v1608_v55  ;;  %1671 = vmatmul.f32.vlgmr.msra.gmra.mxu3 %v4172_v7  ;;  %v1609_v46 = vand.u32 4294901760, %v1608_v55  ;;  %v346_v11 = vadd.f32 %v322_v21, %v274_v59  ;;  %v153_v49 = vadd.f32 %v3188_v63, %v105_v56  ;;  %v4173_v19 = vand.u32 4294901760, %v3487_v26  ;;  %v2015_v63 = vld [vmem:[%s3730_s1 + $0x288] sm:$0xff] }
  0xdf   :  { %1644 = vmatmul.f32.vlgmr.msra.gmra.mxu2 %v4136_v37  ;;  %v707_v35 = vadd.f32 %v683_v23, %v635_v12  ;;  %v610_v22 = vmul.f32 0.08077533, %v586_v9  ;;  %v225_v18 = vadd.f32 %v3196_v25, %v3428_v54  ;;  %v297_v33 = vadd.f32 %v3205_v2, %v4174_v17  ;;  %v4175_v25 = vld [vmem:[#allocation49_spill] sm:$0xff] }
  0xe0   :  { %1690 = vmatpush.msrb.mxu0 %v4173_v19  ;;  %v1610_v16 = vsub.f32 %v1608_v55, %v1609_v46  ;;  %v418_v27 = vadd.f32 %v394_v51, %v346_v11  ;;  %v177_v21 = vmul.f32 0.0014794517, %v153_v49  ;;  %v369_v53 = vadd.f32 %v2015_v63, %v3217_v38  ;;  %v104_v55 = vld [vmem:[%s3730_s1 + $0x2e0] sm:$0xff]  ;;  %v4179_v49 = vld [vmem:[#allocation26_spill] sm:$0xff] }
  0xe1   :  { %v779_v23 = vadd.f32 %v755_v14, %v707_v35  ;;  %v682_v52 = vmul.f32 0.106639, %v658_v0  ;;  %v249_v26 = vmul.f32 0.003804239, %v225_v18  ;;  %v441_v54 = vadd.f32 %v4175_v25, %v3240_v47  ;;  %v4181_v18 = vld [vmem:[#allocation60_spill] sm:$0xff] }
  0xe2   :  { %1694 = vmatpush.msrb.mxu0 %v1597_v31  ;;  %v1611_v58 = vand.u32 4294901760, %v1610_v16  ;;  %v490_v2 = vadd.f32 %v466_v39, %v418_v27  ;;  %v201_v9 = vadd.f32 %v177_v21, %v129_v24  ;;  %v321_v56 = vmul.f32 0.008753463, %v297_v33  ;;  %v4178_v24 = vld [vmem:[#allocation25_spill] sm:$0xff] }
  0xe3   :  { %v1736_v59 = vsel %vm785_vm0, %v779_v23, 0  ;;  %v754_v38 = vmul.f32 0.1259791, %v730_v32  ;;  %v513_v14 = vadd.f32 %v3459_v30, %v3252_v4  ;;  %v585_v31 = vadd.f32 %v3265_v40, %v4139_v41  ;;  %v4182_v23 = vld [vmem:[#allocation47_spill] sm:$0xff] }
  0xe4   :  { %1698 = vmatpush.msrb.mxu0 %v1603_v61  ;;  %v3668_v47 = vand.u32 4294901760, %v1736_v59  ;;  %1612 = vmatpush.msra.mxu1 %v1611_v58  ;;  %v562_v6 = vadd.f32 %v538_v10, %v490_v2  ;;  %v273_v51 = vadd.f32 %v249_v26, %v201_v9  ;;  %v393_v39 = vmul.f32 0.01802341, %v369_v53  ;;  %v815_v58 = vpop.f32.mrf.mxu0  ;;  %v856_v2 = vpop.f32.mrf.mxu1 }
  0xe5   :  { %1614 = vmatmul.f32.vlgmr.msra.gmra.mxu1 %v2635_v29  ;;  %v465_v12 = vmul.f32 0.03320773, %v441_v54  ;;  %v657_v48 = vadd.f32 %v3523_v20, %v3222_v44  ;;  %v128_v4 = vmul.f32 0.133176, %v3338_v34  ;;  %v152_v30 = vadd.f32 %v3494_v28, %v104_v55  ;;  %v4184_v55 = vld [vmem:[#allocation62_spill] sm:$0xff] }
  0xe6   :  { %1702 = vmatpush.msrb.mxu0 %v1609_v46  ;;  %1751 = vmatpush.msrb.mxu2 %v3668_v47  ;;  %v3677_v40 = vsub.f32 %v1736_v59, %v3668_v47  ;;  %v634_v41 = vadd.f32 %v610_v22, %v562_v6  ;;  %v345_v3 = vadd.f32 %v321_v56, %v273_v51  ;;  %v537_v61 = vmul.f32 0.05475029, %v513_v14  ;;  %v4180_v22 = vld [vmem:[#allocation53_spill] sm:$0xff]  ;;  %v886_v14 = vpop.f32.mrf.mxu2 }
  0xe7   :  { %1721 = vmatpush.msrb.mxu1 %v3477_v8  ;;  %v609_v10 = vmul.f32 0.08077533, %v585_v31  ;;  %v176_v42 = vmul.f32 0.0014794517, %v152_v30  ;;  %v224_v44 = vadd.f32 %v4143_v45, %v3468_v36  ;;  %v296_v34 = vadd.f32 %v3297_v15, %v4141_v62  ;;  %1704 = vmatmul.f32.vlgmr.msrb.gmra.mxu0 %v2635_v29  ;;  %v2016_v8 = vld [vmem:[%s3730_s1 + $0x280] sm:$0xff]  ;;  %v4176_v15 = vld [vmem:[#allocation28_spill] sm:$0xff] }
  0xe8   :  { %v1781_v28 = vand.u32 4294901760, %v3677_v40  ;;  %v706_v20 = vadd.f32 %v682_v52, %v634_v41  ;;  %v417_v0 = vadd.f32 %v393_v39, %v345_v3  ;;  %v368_v5 = vadd.f32 %v2016_v8, %v3310_v50  ;;  %1822 = vmatpush.msra.mxu0 %v3677_v40  ;;  %v4177_v62 = vld [vmem:[#allocation32_spill] sm:$0xff]  ;;  %v4183_v52 = vld [vmem:[#allocation61_spill] sm:$0xff]  ;;  %s2043_s1 = smov [#allocation2]  }
  0xe9   :  { %1723 = vmatpush.msrb.mxu1 %v3539_v60  ;;  %v200_v36 = vadd.f32 %v176_v42, %v128_v4  ;;  %v248_v45 = vmul.f32 0.003804239, %v224_v44  ;;  %v320_v13 = vmul.f32 0.008753463, %v296_v34  ;;  %v440_v32 = vadd.f32 %v4177_v62, %v4176_v15  ;;  %s1929_s30 = sshll.u32 %s2043_s1, 4  ;;  %s1930_s30 = int_to_ptr.vmem [resolvable:$true] %s1929_s30 }
  0xea   :  { %v1782_v46 = vsub.f32 %v3677_v40, %v1781_v28  ;;  %v778_v11 = vadd.f32 %v754_v38, %v706_v20  ;;  %v489_v60 = vadd.f32 %v465_v12, %v417_v0  ;;  %v729_v35 = vadd.f32 %v4179_v49, %v4178_v24  ;;  %v4186_v12 = vld [vmem:[#allocation27_spill] sm:$0xff] }
  0xeb   :  { %1725 = vmatpush.msrb.mxu1 %v3590_v43  ;;  %v272_v50 = vadd.f32 %v248_v45, %v200_v36  ;;  %v392_v19 = vmul.f32 0.01802341, %v368_v5  ;;  %v512_v17 = vadd.f32 %v4181_v18, %v4180_v22  ;;  %v681_v21 = vmul.f32 0.106639, %v657_v48  ;;  %v4187_v48 = vld [vmem:[#allocation46_spill] sm:$0xff] }
  0xec   :  { %v1783_v33 = vand.u32 4294901760, %v1782_v46  ;;  %v3702_v16 = vand.u32 4294901760, %v778_v11  ;;  %v561_v27 = vadd.f32 %v537_v61, %v489_v60  ;;  %v464_v53 = vmul.f32 0.03320773, %v440_v32  ;;  %v913_v61 = vpop.f32.mrf.mxu3  ;;  %v946_v36 = vpop.f32.mrf.mxu0 }
  0xed   :  { %1727 = vmatpush.msrb.mxu1 %v3623_v57  ;;  %v344_v63 = vadd.f32 %v320_v13, %v272_v50  ;;  %v584_v26 = vadd.f32 %v4183_v52, %v4182_v23  ;;  %v753_v54 = vmul.f32 0.1259791, %v729_v35  ;;  %v536_v56 = vmul.f32 0.05475029, %v512_v17  ;;  %v4185_v57 = vld [vmem:[#allocation33_spill] sm:$0xff]  ;;  %v971_v45 = vpop.f32.mrf.mxu1 }
  0xee   :  { %1729 = vmatmul.f32.vlgmr.msrb.gmra.mxu1 %v2635_v29  ;;  %1784 = vmatpush.msrb.mxu3 %v1783_v33  ;;  %v1786_v43 = vsub.f32 %v778_v11, %v3702_v16  ;;  %v633_v25 = vadd.f32 %v609_v10, %v561_v27  ;;  %v656_v59 = vadd.f32 %v4185_v57, %v4184_v55 }
  0xef   :  { %1753 = vmatpush.msrb.mxu2 %v3702_v16  ;;  %v416_v9 = vadd.f32 %v392_v19, %v344_v63  ;;  %1851 = vmatpush.msra.mxu1 %v3668_v47  ;;  %v857_v38 = vadd.f32 %v856_v2, %v815_v58  ;;  %v608_v39 = vmul.f32 0.08077533, %v584_v26  ;;  %v728_v4 = vadd.f32 %v4187_v48, %v4186_v12 }
  0xf0   :  { %v1787_v31 = vand.u32 4294901760, %v1786_v43  ;;  %v705_v6 = vadd.f32 %v681_v21, %v633_v25  ;;  %1825 = vmatpush.msra.mxu0 %v1786_v43  ;;  %v680_v42 = vmul.f32 0.106639, %v656_v59 }
  0xf1   :  { %v488_v51 = vadd.f32 %v464_v53, %v416_v9  ;;  %1853 = vmatpush.msra.mxu1 %v3702_v16  ;;  %v887_v30 = vadd.f32 %v886_v14, %v857_v38  ;;  %v752_v8 = vmul.f32 0.1259791, %v728_v4 }
  0xf2   :  { %v1788_v41 = vsub.f32 %v1786_v43, %v1787_v31  ;;  %v777_v3 = vadd.f32 %v753_v54, %v705_v6 }
  0xf3   :  { %v560_v10 = vadd.f32 %v536_v56, %v488_v51  ;;  %v914_v44 = vadd.f32 %v913_v61, %v887_v30 }
  0xf4   :  { %v1789_v34 = vand.u32 4294901760, %v1788_v41  ;;  %v1754_v20 = vand.u32 4294901760, %v777_v3  ;;  %v1004_v50 = vpop.f32.mrf.mxu2  ;;  %v1075_v17 = vpop.f32.mrf.mxu0 }
  0xf5   :  { %v632_v0 = vadd.f32 %v608_v39, %v560_v10  ;;  %v947_v15 = vadd.f32 %v946_v36, %v914_v44  ;;  %v1102_v40 = vpop.f32.mrf.mxu1 }
  0xf6   :  { %1790 = vmatpush.msrb.mxu3 %v1789_v34  ;;  %1755 = vmatpush.msrb.mxu2 %v1754_v20  ;;  %v1792_v5 = vsub.f32 %v777_v3, %v1754_v20 }
  0xf7   :  { %v704_v13 = vadd.f32 %v680_v42, %v632_v0  ;;  %1855 = vmatpush.msra.mxu1 %v1754_v20  ;;  %v972_v46 = vadd.f32 %v971_v45, %v947_v15 }
  0xf8   :  { %v1793_v62 = vand.u32 4294901760, %v1792_v5  ;;  %1828 = vmatpush.msra.mxu0 %v1792_v5 }
  0xf9   :  { %v776_v32 = vadd.f32 %v752_v8, %v704_v13  ;;  %974 = vst [vmem:[#allocation2] sm:$0xff] %v972_v46 }
  0xfa   :  { %v1794_v11 = vsub.f32 %v1792_v5, %v1793_v62 }
  0xfb   :  { %v1756_v60 = vand.u32 4294901760, %v776_v32 }
  0xfc   :  { %v1795_v24 = vand.u32 4294901760, %v1794_v11  ;;  %v1045_v18 = vpop.f32.mrf.mxu3 }
  0xfd   :  { %1757 = vmatpush.msrb.mxu2 %v1756_v60  ;;  %v1798_v49 = vsub.f32 %v776_v32, %v1756_v60  ;;  %1857 = vmatpush.msra.mxu1 %v1756_v60 }
  0xfe   :  { %1796 = vmatpush.msrb.mxu3 %v1795_v24  ;;  %1763 = vmatmul.f32.vlgmr.msrb.gmra.mxu2 %v4130_v1  ;;  %v1046_v1 = vadd.f32 %v1045_v18, %v1004_v50 }
  0xff   :  { %v1799_v35 = vand.u32 4294901760, %v1798_v49  ;;  %1880 = vmatpush.msra.mxu2 %v1781_v28  ;;  %1831 = vmatpush.msra.mxu0 %v1798_v49 }
 0x100   :  { %1834 = vmatmul.f32.vlgmr.msra.gmra.mxu0 %v4136_v37  ;;  %1861 = vmatmul.f32.vlgmr.msra.gmra.mxu1 %v4172_v7  ;;  %v1076_v28 = vadd.f32 %v1075_v17, %v1046_v1  ;;  %v1135_v37 = vpop.f32.mrf.mxu2 }
 0x101   :  { %v1800_v19 = vsub.f32 %v1798_v49, %v1799_v35  ;;  %1884 = vmatpush.msra.mxu2 %v1787_v31 }
 0x102   :  { %v1103_v7 = vadd.f32 %v1102_v40, %v1076_v28 }
 0x103   :  { %v1801_v22 = vand.u32 4294901760, %v1800_v19  ;;  %1888 = vmatpush.msra.mxu2 %v1793_v62 }
 0x104   :  { %v1136_v33 = vadd.f32 %v1135_v37, %v1103_v7  ;;  %v1160_v27 = vpop.f32.mrf.mxu3 }
 0x105   :  { %1802 = vmatpush.msrb.mxu3 %v1801_v22  ;;  %1892 = vmatpush.msra.mxu2 %v1799_v35 }
 0x106   :  { %1804 = vmatmul.f32.vlgmr.msrb.gmra.mxu3 %v2635_v29  ;;  %1894 = vmatmul.f32.vlgmr.msra.gmra.mxu2 %v2635_v29  ;;  %v1161_v21 = vadd.f32 %v1160_v27, %v1136_v33 }
 0x107   :  { %1911 = vmatpush.msra.mxu3 %v3668_v47 }
 0x108   :  { %1164 = vst [vmem:[#allocation2 + $0x8] sm:$0xff] %v1161_v21 }
 0x109   :  { %1913 = vmatpush.msra.mxu3 %v3702_v16 }
 0x10b   :  { %1915 = vmatpush.msra.mxu3 %v1754_v20 }
 0x10d   :  { %1917 = vmatpush.msra.mxu3 %v1756_v60 }
 0x10e   :  { %1919 = vmatmul.f32.vlgmr.msra.gmra.mxu3 %v2635_v29 }
 0x114   :  { %v1194_v63 = vpop.f32.mrf.mxu0 }
 0x11a   :  { %v1292_v47 = vpop.f32.mrf.mxu3 }
 0x11c   :  { %v1235_v53 = vpop.f32.mrf.mxu1  ;;  %v1265_v23 = vpop.f32.mrf.mxu2 }
 0x11d   :  { %v1236_v52 = vadd.f32 %v1235_v53, %v1194_v63 }
 0x11f   :  { %v1266_v26 = vadd.f32 %v1265_v23, %v1236_v52 }
 0x120   :  { %v1325_v25 = vpop.f32.mrf.mxu0 }
 0x121   :  { %v1293_v43 = vadd.f32 %v1292_v47, %v1266_v26 }
 0x123   :  { %v1326_v54 = vadd.f32 %v1325_v25, %v1293_v43 }
 0x125   :  { %v1350_v16 = vpop.f32.mrf.mxu1 }
 0x126   :  { %v1351_v58 = vadd.f32 %v1350_v16, %v1326_v54 }
 0x128   :  { %1354 = vst [vmem:[#allocation2 + $0x10] sm:$0xff] %v1351_v58 }
 0x139   :  { %v1482_v57 = vpop.f32.mrf.mxu1 }
 0x13b   :  { %v1455_v56 = vpop.f32.mrf.mxu0 }
 0x13f   :  { %v1384_v2 = vpop.f32.mrf.mxu2 }
 0x147   :  { %v1425_v9 = vpop.f32.mrf.mxu3 }
 0x148   :  { %v1426_v55 = vadd.f32 %v1425_v9, %v1384_v2  ;;  %v1515_v59 = vpop.f32.mrf.mxu2 }
 0x14a   :  { %v1456_v29 = vadd.f32 %v1455_v56, %v1426_v55 }
 0x14c   :  { %v1483_v38 = vadd.f32 %v1482_v57, %v1456_v29 }
 0x14e   :  { %v1516_v14 = vadd.f32 %v1515_v59, %v1483_v38 }
 0x14f   :  { %v1540_v31 = vpop.f32.mrf.mxu3 }
 0x150   :  { %v1541_v6 = vadd.f32 %v1540_v31, %v1516_v14 }
 0x152   :  { %1544 = vst [vmem:[#allocation2 + $0x18] sm:$0xff] %v1541_v6 }
 0x15a   :  { %v1574_v51 = vpop.f32.mrf.mxu0 }
 0x161   :  { %v1672_v30 = vpop.f32.mrf.mxu3 }
 0x162   :  { %v1615_v39 = vpop.f32.mrf.mxu1  ;;  %v1645_v12 = vpop.f32.mrf.mxu2 }
 0x163   :  { %v1616_v48 = vadd.f32 %v1615_v39, %v1574_v51 }
 0x164   :  { %v1705_v3 = vpop.f32.mrf.mxu0 }
 0x165   :  { %v1646_v4 = vadd.f32 %v1645_v12, %v1616_v48 }
 0x167   :  { %v1673_v41 = vadd.f32 %v1672_v30, %v1646_v4 }
 0x169   :  { %v1706_v61 = vadd.f32 %v1705_v3, %v1673_v41 }
 0x16b   :  { %v1730_v10 = vpop.f32.mrf.mxu1 }
 0x16c   :  { %v1731_v42 = vadd.f32 %v1730_v10, %v1706_v61 }
 0x16e   :  { %1734 = vst [vmem:[#allocation2 + $0x20] sm:$0xff] %v1731_v42 }
 0x17d   :  { %v1835_v20 = vpop.f32.mrf.mxu0  ;;  %v1862_v8 = vpop.f32.mrf.mxu1 }
 0x181   :  { %v1764_v44 = vpop.f32.mrf.mxu2 }
 0x189   :  { %v1805_v34 = vpop.f32.mrf.mxu3  ;;  %v1895_v36 = vpop.f32.mrf.mxu2 }
 0x18a   :  { %v1806_v0 = vadd.f32 %v1805_v34, %v1764_v44 }
 0x18c   :  { %v1836_v5 = vadd.f32 %v1835_v20, %v1806_v0 }
 0x18e   :  { %v1863_v45 = vadd.f32 %v1862_v8, %v1836_v5 }
 0x190   :  { %v1896_v13 = vadd.f32 %v1895_v36, %v1863_v45 }
 0x191   :  { %v1920_v15 = vpop.f32.mrf.mxu3 }
 0x192   :  { %v1921_v62 = vadd.f32 %v1920_v15, %v1896_v13 }
 0x194   :  { %1924 = vst [vmem:[#allocation2 + $0x28] sm:$0xff] %v1921_v62 }
 0x195   :  { %1937 = dma.vmem_to_hbm [thread:$0]  %s1930_s30, 768, %s1932_s5, [#allocation3], %s2044_s6, %s2044_s6, %s2045_s7  }
 0x196   :  { %2041 = dma.done.wait [#allocation3], 768  }
 0x197   :  { %2042 = vsyncadd [#allocation3], 4294966528 }
 0x198   :  { %1942 = vsyncpa [#allocation3], 1 }

</bundles_post_ra>
